<compile_context>
chip_gen: v7x
topology: tpu7x:2x2x1
jax: 0.10.0
libtpu: 0.0.40
codegen_flags: <defaults>
</compile_context>

<pallas_src>
import functools

import jax
import jax.numpy as jnp
from jax.experimental import pallas as pl
from jax.experimental.pallas import tpu as pltpu


def _diffeq_solver_kernel(ts_ref,                          # scalar-prefetch: [T] times (SMEM)
                          y0_ref,                          # [N_blk, D]   first_point block
                          w1_ref, b1_ref, w2_ref, b2_ref,  # ODE-func MLP params
                          out_ref,                         # [N_blk, T*D] lane-dense trajectory
                          *, n_blk, d, t_steps):
    # Hoist parameter loads + bias broadcasts out of the 4x-traced ode_func and
    # out of the whole time loop (loaded exactly once per kernel invocation).
    w1 = w1_ref[...]
    w2 = w2_ref[...]
    h_dim = w1.shape[1]
    b1 = jnp.broadcast_to(b1_ref[...], (n_blk, h_dim))
    b2 = jnp.broadcast_to(b2_ref[...], (n_blk, d))

    def ode_func(y):
        # f(t, y) = tanh(y @ W1 + b1) @ W2 + b2   (autonomous dynamics; stage
        # times would need threading here if ode_func were time-dependent).
        h = jnp.tanh(jnp.dot(y, w1, preferred_element_type=jnp.float32) + b1)
        return jnp.dot(h, w2, preferred_element_type=jnp.float32) + b2

    # Initial condition: trajectory starts exactly at first_point.
    y = y0_ref[...].astype(jnp.float32)
    out_ref[:, 0:d] = y

    # Statically unrolled classical RK4 between consecutive time stamps.
    # T is a small compile-time constant, so all slice starts are static and
    # the SMEM time reads are static-indexed scalars.
    for t in range(1, t_steps):
        dt = ts_ref[t] - ts_ref[t - 1]
        k1 = ode_func(y)
        k2 = ode_func(y + 0.5 * dt * k1)
        k3 = ode_func(y + 0.5 * dt * k2)
        k4 = ode_func(y + dt * k3)
        y = y + (dt / 6.0) * (k1 + 2.0 * k2 + 2.0 * k3 + k4)
        out_ref[:, t * d:(t + 1) * d] = y


def diffeq_solver(first_point, time_steps, w1, b1, w2, b2,
                  odeint_rtol=None, odeint_atol=None, method=None,
                  block_n=None):
    """first_point: [N, D], time_steps: [T]  ->  pred: [N, T, D]."""
    del odeint_rtol, odeint_atol, method  # fixed-step RK4 (see TODO above)
    N, D = first_point.shape
    T = int(time_steps.shape[0])
    H = w1.shape[1]

    if block_n is None:
        block_n = N
    assert N % block_n == 0, "batch must be divisible by the batch block size"
    n_blocks = N // block_n

    grid_spec = pltpu.PrefetchScalarGridSpec(
        num_scalar_prefetch=1,              # time_steps -> SMEM, scalar reads
        grid=(n_blocks,),                   # independent batch blocks
        in_specs=[
            pl.BlockSpec((block_n, D), lambda i, ts: (i, 0)),   # first_point
            pl.BlockSpec((D, H), lambda i, ts: (0, 0)),         # W1
            pl.BlockSpec((1, H), lambda i, ts: (0, 0)),         # b1
            pl.BlockSpec((H, D), lambda i, ts: (0, 0)),         # W2
            pl.BlockSpec((1, D), lambda i, ts: (0, 0)),         # b2
        ],
        # Lane-dense output slab: last dim T*D is a multiple of 128 at these
        # shapes, and its memory layout equals [N, T, D] row-major, so the
        # wrapper reshape below is free (no transpose pass over HBM).
        out_specs=pl.BlockSpec((block_n, T * D), lambda i, ts: (i, 0)),
    )

    out_flat = pl.pallas_call(
        functools.partial(_diffeq_solver_kernel, n_blk=block_n, d=D, t_steps=T),
        out_shape=jax.ShapeDtypeStruct((N, T * D), jnp.float32),
        grid_spec=grid_spec,
        compiler_params=pltpu.CompilerParams(
            # Batch blocks are fully independent (the time recurrence lives
            # entirely inside one invocation) -> parallel; shards across the
            # two TensorCores on v7x when n_blocks > 1.
            dimension_semantics=("parallel",),
        ),
    )(time_steps, first_point, w1, b1, w2, b2)

    return out_flat.reshape(N, T, D)


def _reference_solver(first_point, time_steps, w1, b1, w2, b2):
    """Pure-JAX RK4 reference for correctness checking."""
    def f(y):
        return jnp.tanh(y @ w1 + b1) @ w2 + b2

    def step(y, ts_pair):
        t0, t1 = ts_pair
        dt = t1 - t0
        k1 = f(y)
        k2 = f(y + 0.5 * dt * k1)
        k3 = f(y + 0.5 * dt * k2)
        k4 = f(y + dt * k3)
        y_new = y + (dt / 6.0) * (k1 + 2 * k2 + 2 * k3 + k4)
        return y_new, y_new

    pairs = (time_steps[:-1], time_steps[1:])
    _, traj = jax.lax.scan(step, first_point, pairs)
    pred = jnp.concatenate([first_point[None], traj], axis=0)   # [T, N, D]
    return jnp.transpose(pred, (1, 0, 2))                        # [N, T, D]


if __name__ == "__main__":
    N, D, H, T = 8, 32, 64, 8   # batch, latent dim, ODE-func hidden dim, time steps

    key = jax.random.PRNGKey(0)
    k_y0, k_w1, k_b1, k_w2, k_b2 = jax.random.split(key, 5)

    first_point = jax.random.normal(k_y0, (N, D), dtype=jnp.float32)
    time_steps = jnp.linspace(0.0, 1.0, T, dtype=jnp.float32)

    # Deterministic synthetic ODE-func parameters (small scale => stable dynamics).
    w1 = 0.1 * jax.random.normal(k_w1, (D, H), dtype=jnp.float32)
    b1 = 0.1 * jax.random.normal(k_b1, (1, H), dtype=jnp.float32)
    w2 = 0.1 * jax.random.normal(k_w2, (H, D), dtype=jnp.float32)
    b2 = 0.1 * jax.random.normal(k_b2, (1, D), dtype=jnp.float32)

    pred = diffeq_solver(first_point, time_steps, w1, b1, w2, b2)
    pred = jax.block_until_ready(pred)

    # Same assertions as the PyTorch module.
    assert pred.shape == (N, T, D)
    assert float(jnp.mean(pred[:, 0, :] - first_point)) < 0.001
    assert pred.shape[0] == first_point.shape[0]
    assert pred.shape[1] == time_steps.shape[0]
    assert pred.shape[2] == first_point.shape[1]

    # Cross-check against a pure-JAX reference.
    ref = jax.block_until_ready(
        _reference_solver(first_point, time_steps, w1, b1, w2, b2)
    )
    assert jnp.allclose(pred, ref, rtol=1e-5, atol=1e-5), (
        float(jnp.max(jnp.abs(pred - ref)))
    )

    print("KERNEL_OK")
</pallas_src>

<mosaic_0001>
module attributes {stable_mosaic.version = 11 : i64} {
  func.func @_diffeq_solver_kernel(%arg0: i32, %arg1: memref<8xf32, #tpu.memory_space<smem>>, %arg2: memref<8x32xf32, #tpu.memory_space<vmem>>, %arg3: memref<32x64xf32, #tpu.memory_space<vmem>>, %arg4: memref<1x64xf32, #tpu.memory_space<vmem>>, %arg5: memref<64x32xf32, #tpu.memory_space<vmem>>, %arg6: memref<1x32xf32, #tpu.memory_space<vmem>>, %arg7: memref<8x256xf32, #tpu.memory_space<vmem>>) attributes {dimension_semantics = [#tpu.dimension_semantics<parallel>], iteration_bounds = array<i64: 1>, scalar_prefetch = 1 : i64, scratch_operands = 0 : i64, tpu.core_type = #tpu.core_type<tc>, window_params = [{transform_indices = @transform_0, window_bounds = array<i64: 8, 32>}, {pipeline_mode = #tpu.pipeline_mode<synchronous>, transform_indices = @transform_1, window_bounds = array<i64: 32, 64>}, {pipeline_mode = #tpu.pipeline_mode<synchronous>, transform_indices = @transform_2, window_bounds = array<i64: 1, 64>}, {pipeline_mode = #tpu.pipeline_mode<synchronous>, transform_indices = @transform_3, window_bounds = array<i64: 64, 32>}, {pipeline_mode = #tpu.pipeline_mode<synchronous>, transform_indices = @transform_4, window_bounds = array<i64: 1, 32>}, {transform_indices = @transform_5, window_bounds = array<i64: 8, 256>}]} {
    %c0 = arith.constant 0 : index
    %c0_0 = arith.constant 0 : index
    %0 = vector.load %arg3[%c0, %c0_0] : memref<32x64xf32, #tpu.memory_space<vmem>>, vector<32x64xf32>
    %c0_1 = arith.constant 0 : index
    %c0_2 = arith.constant 0 : index
    %1 = vector.load %arg5[%c0_1, %c0_2] : memref<64x32xf32, #tpu.memory_space<vmem>>, vector<64x32xf32>
    %c0_3 = arith.constant 0 : index
    %c0_4 = arith.constant 0 : index
    %2 = vector.load %arg4[%c0_3, %c0_4] : memref<1x64xf32, #tpu.memory_space<vmem>>, vector<1x64xf32>
    %3 = vector.shape_cast %2 : vector<1x64xf32> to vector<1x64xf32>
    %4 = vector.broadcast %3 : vector<1x64xf32> to vector<8x64xf32>
    %c0_5 = arith.constant 0 : index
    %c0_6 = arith.constant 0 : index
    %5 = vector.load %arg6[%c0_5, %c0_6] : memref<1x32xf32, #tpu.memory_space<vmem>>, vector<1x32xf32>
    %6 = vector.shape_cast %5 : vector<1x32xf32> to vector<1x32xf32>
    %7 = vector.broadcast %6 : vector<1x32xf32> to vector<8x32xf32>
    %c0_7 = arith.constant 0 : index
    %c0_8 = arith.constant 0 : index
    %8 = vector.load %arg2[%c0_7, %c0_8] : memref<8x32xf32, #tpu.memory_space<vmem>>, vector<8x32xf32>
    %c0_9 = arith.constant 0 : index
    %c0_10 = arith.constant 0 : index
    %9 = vector.load %arg7[%c0_9, %c0_10] : memref<8x256xf32, #tpu.memory_space<vmem>>, vector<8x32xf32>
    tpu.vector_store %arg7[%c0_9, %c0_10], %8 {strides = array<i32>} : memref<8x256xf32, #tpu.memory_space<vmem>>, vector<8x32xf32>,
    %c1 = arith.constant 1 : index
    %10 = memref.load %arg1[%c1] : memref<8xf32, #tpu.memory_space<smem>>
    %c0_11 = arith.constant 0 : index
    %11 = memref.load %arg1[%c0_11] : memref<8xf32, #tpu.memory_space<smem>>
    %12 = arith.subf %10, %11 : f32
    %cst = arith.constant dense<0.000000e+00> : vector<8x64xf32>
    %13 = tpu.matmul %8, %0, %cst {dimension_numbers = #tpu.dot_dimension_numbers<[1], [0], [0], [1], [0, 0, 1, 1], [], []>} : vector<8x32xf32>, vector<32x64xf32>, vector<8x64xf32> -> vector<8x64xf32>
    %14 = arith.addf %13, %4 : vector<8x64xf32>
    %15 = math.tanh %14 : vector<8x64xf32>
    %cst_12 = arith.constant dense<0.000000e+00> : vector<8x32xf32>
    %16 = tpu.matmul %15, %1, %cst_12 {dimension_numbers = #tpu.dot_dimension_numbers<[1], [0], [0], [1], [0, 0, 1, 1], [], []>} : vector<8x64xf32>, vector<64x32xf32>, vector<8x32xf32> -> vector<8x32xf32>
    %17 = arith.addf %16, %7 : vector<8x32xf32>
    %cst_13 = arith.constant 5.000000e-01 : f32
    %18 = arith.mulf %cst_13, %12 : f32
    %19 = vector.broadcast %18 : f32 to vector<8x32xf32>
    %20 = arith.mulf %19, %17 : vector<8x32xf32>
    %21 = arith.addf %8, %20 : vector<8x32xf32>
    %cst_14 = arith.constant dense<0.000000e+00> : vector<8x64xf32>
    %22 = tpu.matmul %21, %0, %cst_14 {dimension_numbers = #tpu.dot_dimension_numbers<[1], [0], [0], [1], [0, 0, 1, 1], [], []>} : vector<8x32xf32>, vector<32x64xf32>, vector<8x64xf32> -> vector<8x64xf32>
    %23 = arith.addf %22, %4 : vector<8x64xf32>
    %24 = math.tanh %23 : vector<8x64xf32>
    %cst_15 = arith.constant dense<0.000000e+00> : vector<8x32xf32>
    %25 = tpu.matmul %24, %1, %cst_15 {dimension_numbers = #tpu.dot_dimension_numbers<[1], [0], [0], [1], [0, 0, 1, 1], [], []>} : vector<8x64xf32>, vector<64x32xf32>, vector<8x32xf32> -> vector<8x32xf32>
    %26 = arith.addf %25, %7 : vector<8x32xf32>
    %cst_16 = arith.constant 5.000000e-01 : f32
    %27 = arith.mulf %cst_16, %12 : f32
    %28 = vector.broadcast %27 : f32 to vector<8x32xf32>
    %29 = arith.mulf %28, %26 : vector<8x32xf32>
    %30 = arith.addf %8, %29 : vector<8x32xf32>
    %cst_17 = arith.constant dense<0.000000e+00> : vector<8x64xf32>
    %31 = tpu.matmul %30, %0, %cst_17 {dimension_numbers = #tpu.dot_dimension_numbers<[1], [0], [0], [1], [0, 0, 1, 1], [], []>} : vector<8x32xf32>, vector<32x64xf32>, vector<8x64xf32> -> vector<8x64xf32>
    %32 = arith.addf %31, %4 : vector<8x64xf32>
    %33 = math.tanh %32 : vector<8x64xf32>
    %cst_18 = arith.constant dense<0.000000e+00> : vector<8x32xf32>
    %34 = tpu.matmul %33, %1, %cst_18 {dimension_numbers = #tpu.dot_dimension_numbers<[1], [0], [0], [1], [0, 0, 1, 1], [], []>} : vector<8x64xf32>, vector<64x32xf32>, vector<8x32xf32> -> vector<8x32xf32>
    %35 = arith.addf %34, %7 : vector<8x32xf32>
    %36 = vector.broadcast %12 : f32 to vector<8x32xf32>
    %37 = arith.mulf %36, %35 : vector<8x32xf32>
    %38 = arith.addf %8, %37 : vector<8x32xf32>
    %cst_19 = arith.constant dense<0.000000e+00> : vector<8x64xf32>
    %39 = tpu.matmul %38, %0, %cst_19 {dimension_numbers = #tpu.dot_dimension_numbers<[1], [0], [0], [1], [0, 0, 1, 1], [], []>} : vector<8x32xf32>, vector<32x64xf32>, vector<8x64xf32> -> vector<8x64xf32>
    %40 = arith.addf %39, %4 : vector<8x64xf32>
    %41 = math.tanh %40 : vector<8x64xf32>
    %cst_20 = arith.constant dense<0.000000e+00> : vector<8x32xf32>
    %42 = tpu.matmul %41, %1, %cst_20 {dimension_numbers = #tpu.dot_dimension_numbers<[1], [0], [0], [1], [0, 0, 1, 1], [], []>} : vector<8x64xf32>, vector<64x32xf32>, vector<8x32xf32> -> vector<8x32xf32>
    %43 = arith.addf %42, %7 : vector<8x32xf32>
    %cst_21 = arith.constant 6.000000e+00 : f32
    %44 = arith.divf %12, %cst_21 : f32
    %cst_22 = arith.constant 2.000000e+00 : f32
    %45 = vector.broadcast %cst_22 : f32 to vector<8x32xf32>
    %46 = arith.mulf %45, %26 : vector<8x32xf32>
    %47 = arith.addf %17, %46 : vector<8x32xf32>
    %cst_23 = arith.constant 2.000000e+00 : f32
    %48 = vector.broadcast %cst_23 : f32 to vector<8x32xf32>
    %49 = arith.mulf %48, %35 : vector<8x32xf32>
    %50 = arith.addf %47, %49 : vector<8x32xf32>
    %51 = arith.addf %50, %43 : vector<8x32xf32>
    %52 = vector.broadcast %44 : f32 to vector<8x32xf32>
    %53 = arith.mulf %52, %51 : vector<8x32xf32>
    %54 = arith.addf %8, %53 : vector<8x32xf32>
    %c0_24 = arith.constant 0 : index
    %c32 = arith.constant 32 : index
    %55 = vector.load %arg7[%c0_24, %c32] : memref<8x256xf32, #tpu.memory_space<vmem>>, vector<8x32xf32>
    tpu.vector_store %arg7[%c0_24, %c32], %54 {strides = array<i32>} : memref<8x256xf32, #tpu.memory_space<vmem>>, vector<8x32xf32>,
    %c2 = arith.constant 2 : index
    %56 = memref.load %arg1[%c2] : memref<8xf32, #tpu.memory_space<smem>>
    %c1_25 = arith.constant 1 : index
    %57 = memref.load %arg1[%c1_25] : memref<8xf32, #tpu.memory_space<smem>>
    %58 = arith.subf %56, %57 : f32
    %cst_26 = arith.constant dense<0.000000e+00> : vector<8x64xf32>
    %59 = tpu.matmul %54, %0, %cst_26 {dimension_numbers = #tpu.dot_dimension_numbers<[1], [0], [0], [1], [0, 0, 1, 1], [], []>} : vector<8x32xf32>, vector<32x64xf32>, vector<8x64xf32> -> vector<8x64xf32>
    %60 = arith.addf %59, %4 : vector<8x64xf32>
    %61 = math.tanh %60 : vector<8x64xf32>
    %cst_27 = arith.constant dense<0.000000e+00> : vector<8x32xf32>
    %62 = tpu.matmul %61, %1, %cst_27 {dimension_numbers = #tpu.dot_dimension_numbers<[1], [0], [0], [1], [0, 0, 1, 1], [], []>} : vector<8x64xf32>, vector<64x32xf32>, vector<8x32xf32> -> vector<8x32xf32>
    %63 = arith.addf %62, %7 : vector<8x32xf32>
    %cst_28 = arith.constant 5.000000e-01 : f32
    %64 = arith.mulf %cst_28, %58 : f32
    %65 = vector.broadcast %64 : f32 to vector<8x32xf32>
    %66 = arith.mulf %65, %63 : vector<8x32xf32>
    %67 = arith.addf %54, %66 : vector<8x32xf32>
    %cst_29 = arith.constant dense<0.000000e+00> : vector<8x64xf32>
    %68 = tpu.matmul %67, %0, %cst_29 {dimension_numbers = #tpu.dot_dimension_numbers<[1], [0], [0], [1], [0, 0, 1, 1], [], []>} : vector<8x32xf32>, vector<32x64xf32>, vector<8x64xf32> -> vector<8x64xf32>
    %69 = arith.addf %68, %4 : vector<8x64xf32>
    %70 = math.tanh %69 : vector<8x64xf32>
    %cst_30 = arith.constant dense<0.000000e+00> : vector<8x32xf32>
    %71 = tpu.matmul %70, %1, %cst_30 {dimension_numbers = #tpu.dot_dimension_numbers<[1], [0], [0], [1], [0, 0, 1, 1], [], []>} : vector<8x64xf32>, vector<64x32xf32>, vector<8x32xf32> -> vector<8x32xf32>
    %72 = arith.addf %71, %7 : vector<8x32xf32>
    %cst_31 = arith.constant 5.000000e-01 : f32
    %73 = arith.mulf %cst_31, %58 : f32
    %74 = vector.broadcast %73 : f32 to vector<8x32xf32>
    %75 = arith.mulf %74, %72 : vector<8x32xf32>
    %76 = arith.addf %54, %75 : vector<8x32xf32>
    %cst_32 = arith.constant dense<0.000000e+00> : vector<8x64xf32>
    %77 = tpu.matmul %76, %0, %cst_32 {dimension_numbers = #tpu.dot_dimension_numbers<[1], [0], [0], [1], [0, 0, 1, 1], [], []>} : vector<8x32xf32>, vector<32x64xf32>, vector<8x64xf32> -> vector<8x64xf32>
    %78 = arith.addf %77, %4 : vector<8x64xf32>
    %79 = math.tanh %78 : vector<8x64xf32>
    %cst_33 = arith.constant dense<0.000000e+00> : vector<8x32xf32>
    %80 = tpu.matmul %79, %1, %cst_33 {dimension_numbers = #tpu.dot_dimension_numbers<[1], [0], [0], [1], [0, 0, 1, 1], [], []>} : vector<8x64xf32>, vector<64x32xf32>, vector<8x32xf32> -> vector<8x32xf32>
    %81 = arith.addf %80, %7 : vector<8x32xf32>
    %82 = vector.broadcast %58 : f32 to vector<8x32xf32>
    %83 = arith.mulf %82, %81 : vector<8x32xf32>
    %84 = arith.addf %54, %83 : vector<8x32xf32>
    %cst_34 = arith.constant dense<0.000000e+00> : vector<8x64xf32>
    %85 = tpu.matmul %84, %0, %cst_34 {dimension_numbers = #tpu.dot_dimension_numbers<[1], [0], [0], [1], [0, 0, 1, 1], [], []>} : vector<8x32xf32>, vector<32x64xf32>, vector<8x64xf32> -> vector<8x64xf32>
    %86 = arith.addf %85, %4 : vector<8x64xf32>
    %87 = math.tanh %86 : vector<8x64xf32>
    %cst_35 = arith.constant dense<0.000000e+00> : vector<8x32xf32>
    %88 = tpu.matmul %87, %1, %cst_35 {dimension_numbers = #tpu.dot_dimension_numbers<[1], [0], [0], [1], [0, 0, 1, 1], [], []>} : vector<8x64xf32>, vector<64x32xf32>, vector<8x32xf32> -> vector<8x32xf32>
    %89 = arith.addf %88, %7 : vector<8x32xf32>
    %cst_36 = arith.constant 6.000000e+00 : f32
    %90 = arith.divf %58, %cst_36 : f32
    %cst_37 = arith.constant 2.000000e+00 : f32
    %91 = vector.broadcast %cst_37 : f32 to vector<8x32xf32>
    %92 = arith.mulf %91, %72 : vector<8x32xf32>
    %93 = arith.addf %63, %92 : vector<8x32xf32>
    %cst_38 = arith.constant 2.000000e+00 : f32
    %94 = vector.broadcast %cst_38 : f32 to vector<8x32xf32>
    %95 = arith.mulf %94, %81 : vector<8x32xf32>
    %96 = arith.addf %93, %95 : vector<8x32xf32>
    %97 = arith.addf %96, %89 : vector<8x32xf32>
    %98 = vector.broadcast %90 : f32 to vector<8x32xf32>
    %99 = arith.mulf %98, %97 : vector<8x32xf32>
    %100 = arith.addf %54, %99 : vector<8x32xf32>
    %c0_39 = arith.constant 0 : index
    %c64 = arith.constant 64 : index
    %101 = vector.load %arg7[%c0_39, %c64] : memref<8x256xf32, #tpu.memory_space<vmem>>, vector<8x32xf32>
    tpu.vector_store %arg7[%c0_39, %c64], %100 {strides = array<i32>} : memref<8x256xf32, #tpu.memory_space<vmem>>, vector<8x32xf32>,
    %c3 = arith.constant 3 : index
    %102 = memref.load %arg1[%c3] : memref<8xf32, #tpu.memory_space<smem>>
    %c2_40 = arith.constant 2 : index
    %103 = memref.load %arg1[%c2_40] : memref<8xf32, #tpu.memory_space<smem>>
    %104 = arith.subf %102, %103 : f32
    %cst_41 = arith.constant dense<0.000000e+00> : vector<8x64xf32>
    %105 = tpu.matmul %100, %0, %cst_41 {dimension_numbers = #tpu.dot_dimension_numbers<[1], [0], [0], [1], [0, 0, 1, 1], [], []>} : vector<8x32xf32>, vector<32x64xf32>, vector<8x64xf32> -> vector<8x64xf32>
    %106 = arith.addf %105, %4 : vector<8x64xf32>
    %107 = math.tanh %106 : vector<8x64xf32>
    %cst_42 = arith.constant dense<0.000000e+00> : vector<8x32xf32>
    %108 = tpu.matmul %107, %1, %cst_42 {dimension_numbers = #tpu.dot_dimension_numbers<[1], [0], [0], [1], [0, 0, 1, 1], [], []>} : vector<8x64xf32>, vector<64x32xf32>, vector<8x32xf32> -> vector<8x32xf32>
    %109 = arith.addf %108, %7 : vector<8x32xf32>
    %cst_43 = arith.constant 5.000000e-01 : f32
    %110 = arith.mulf %cst_43, %104 : f32
    %111 = vector.broadcast %110 : f32 to vector<8x32xf32>
    %112 = arith.mulf %111, %109 : vector<8x32xf32>
    %113 = arith.addf %100, %112 : vector<8x32xf32>
    %cst_44 = arith.constant dense<0.000000e+00> : vector<8x64xf32>
    %114 = tpu.matmul %113, %0, %cst_44 {dimension_numbers = #tpu.dot_dimension_numbers<[1], [0], [0], [1], [0, 0, 1, 1], [], []>} : vector<8x32xf32>, vector<32x64xf32>, vector<8x64xf32> -> vector<8x64xf32>
    %115 = arith.addf %114, %4 : vector<8x64xf32>
    %116 = math.tanh %115 : vector<8x64xf32>
    %cst_45 = arith.constant dense<0.000000e+00> : vector<8x32xf32>
    %117 = tpu.matmul %116, %1, %cst_45 {dimension_numbers = #tpu.dot_dimension_numbers<[1], [0], [0], [1], [0, 0, 1, 1], [], []>} : vector<8x64xf32>, vector<64x32xf32>, vector<8x32xf32> -> vector<8x32xf32>
    %118 = arith.addf %117, %7 : vector<8x32xf32>
    %cst_46 = arith.constant 5.000000e-01 : f32
    %119 = arith.mulf %cst_46, %104 : f32
    %120 = vector.broadcast %119 : f32 to vector<8x32xf32>
    %121 = arith.mulf %120, %118 : vector<8x32xf32>
    %122 = arith.addf %100, %121 : vector<8x32xf32>
    %cst_47 = arith.constant dense<0.000000e+00> : vector<8x64xf32>
    %123 = tpu.matmul %122, %0, %cst_47 {dimension_numbers = #tpu.dot_dimension_numbers<[1], [0], [0], [1], [0, 0, 1, 1], [], []>} : vector<8x32xf32>, vector<32x64xf32>, vector<8x64xf32> -> vector<8x64xf32>
    %124 = arith.addf %123, %4 : vector<8x64xf32>
    %125 = math.tanh %124 : vector<8x64xf32>
    %cst_48 = arith.constant dense<0.000000e+00> : vector<8x32xf32>
    %126 = tpu.matmul %125, %1, %cst_48 {dimension_numbers = #tpu.dot_dimension_numbers<[1], [0], [0], [1], [0, 0, 1, 1], [], []>} : vector<8x64xf32>, vector<64x32xf32>, vector<8x32xf32> -> vector<8x32xf32>
    %127 = arith.addf %126, %7 : vector<8x32xf32>
    %128 = vector.broadcast %104 : f32 to vector<8x32xf32>
    %129 = arith.mulf %128, %127 : vector<8x32xf32>
    %130 = arith.addf %100, %129 : vector<8x32xf32>
    %cst_49 = arith.constant dense<0.000000e+00> : vector<8x64xf32>
    %131 = tpu.matmul %130, %0, %cst_49 {dimension_numbers = #tpu.dot_dimension_numbers<[1], [0], [0], [1], [0, 0, 1, 1], [], []>} : vector<8x32xf32>, vector<32x64xf32>, vector<8x64xf32> -> vector<8x64xf32>
    %132 = arith.addf %131, %4 : vector<8x64xf32>
    %133 = math.tanh %132 : vector<8x64xf32>
    %cst_50 = arith.constant dense<0.000000e+00> : vector<8x32xf32>
    %134 = tpu.matmul %133, %1, %cst_50 {dimension_numbers = #tpu.dot_dimension_numbers<[1], [0], [0], [1], [0, 0, 1, 1], [], []>} : vector<8x64xf32>, vector<64x32xf32>, vector<8x32xf32> -> vector<8x32xf32>
    %135 = arith.addf %134, %7 : vector<8x32xf32>
    %cst_51 = arith.constant 6.000000e+00 : f32
    %136 = arith.divf %104, %cst_51 : f32
    %cst_52 = arith.constant 2.000000e+00 : f32
    %137 = vector.broadcast %cst_52 : f32 to vector<8x32xf32>
    %138 = arith.mulf %137, %118 : vector<8x32xf32>
    %139 = arith.addf %109, %138 : vector<8x32xf32>
    %cst_53 = arith.constant 2.000000e+00 : f32
    %140 = vector.broadcast %cst_53 : f32 to vector<8x32xf32>
    %141 = arith.mulf %140, %127 : vector<8x32xf32>
    %142 = arith.addf %139, %141 : vector<8x32xf32>
    %143 = arith.addf %142, %135 : vector<8x32xf32>
    %144 = vector.broadcast %136 : f32 to vector<8x32xf32>
    %145 = arith.mulf %144, %143 : vector<8x32xf32>
    %146 = arith.addf %100, %145 : vector<8x32xf32>
    %c0_54 = arith.constant 0 : index
    %c96 = arith.constant 96 : index
    %147 = vector.load %arg7[%c0_54, %c96] : memref<8x256xf32, #tpu.memory_space<vmem>>, vector<8x32xf32>
    tpu.vector_store %arg7[%c0_54, %c96], %146 {strides = array<i32>} : memref<8x256xf32, #tpu.memory_space<vmem>>, vector<8x32xf32>,
    %c4 = arith.constant 4 : index
    %148 = memref.load %arg1[%c4] : memref<8xf32, #tpu.memory_space<smem>>
    %c3_55 = arith.constant 3 : index
    %149 = memref.load %arg1[%c3_55] : memref<8xf32, #tpu.memory_space<smem>>
    %150 = arith.subf %148, %149 : f32
    %cst_56 = arith.constant dense<0.000000e+00> : vector<8x64xf32>
    %151 = tpu.matmul %146, %0, %cst_56 {dimension_numbers = #tpu.dot_dimension_numbers<[1], [0], [0], [1], [0, 0, 1, 1], [], []>} : vector<8x32xf32>, vector<32x64xf32>, vector<8x64xf32> -> vector<8x64xf32>
    %152 = arith.addf %151, %4 : vector<8x64xf32>
    %153 = math.tanh %152 : vector<8x64xf32>
    %cst_57 = arith.constant dense<0.000000e+00> : vector<8x32xf32>
    %154 = tpu.matmul %153, %1, %cst_57 {dimension_numbers = #tpu.dot_dimension_numbers<[1], [0], [0], [1], [0, 0, 1, 1], [], []>} : vector<8x64xf32>, vector<64x32xf32>, vector<8x32xf32> -> vector<8x32xf32>
    %155 = arith.addf %154, %7 : vector<8x32xf32>
    %cst_58 = arith.constant 5.000000e-01 : f32
    %156 = arith.mulf %cst_58, %150 : f32
    %157 = vector.broadcast %156 : f32 to vector<8x32xf32>
    %158 = arith.mulf %157, %155 : vector<8x32xf32>
    %159 = arith.addf %146, %158 : vector<8x32xf32>
    %cst_59 = arith.constant dense<0.000000e+00> : vector<8x64xf32>
    %160 = tpu.matmul %159, %0, %cst_59 {dimension_numbers = #tpu.dot_dimension_numbers<[1], [0], [0], [1], [0, 0, 1, 1], [], []>} : vector<8x32xf32>, vector<32x64xf32>, vector<8x64xf32> -> vector<8x64xf32>
    %161 = arith.addf %160, %4 : vector<8x64xf32>
    %162 = math.tanh %161 : vector<8x64xf32>
    %cst_60 = arith.constant dense<0.000000e+00> : vector<8x32xf32>
    %163 = tpu.matmul %162, %1, %cst_60 {dimension_numbers = #tpu.dot_dimension_numbers<[1], [0], [0], [1], [0, 0, 1, 1], [], []>} : vector<8x64xf32>, vector<64x32xf32>, vector<8x32xf32> -> vector<8x32xf32>
    %164 = arith.addf %163, %7 : vector<8x32xf32>
    %cst_61 = arith.constant 5.000000e-01 : f32
    %165 = arith.mulf %cst_61, %150 : f32
    %166 = vector.broadcast %165 : f32 to vector<8x32xf32>
    %167 = arith.mulf %166, %164 : vector<8x32xf32>
    %168 = arith.addf %146, %167 : vector<8x32xf32>
    %cst_62 = arith.constant dense<0.000000e+00> : vector<8x64xf32>
    %169 = tpu.matmul %168, %0, %cst_62 {dimension_numbers = #tpu.dot_dimension_numbers<[1], [0], [0], [1], [0, 0, 1, 1], [], []>} : vector<8x32xf32>, vector<32x64xf32>, vector<8x64xf32> -> vector<8x64xf32>
    %170 = arith.addf %169, %4 : vector<8x64xf32>
    %171 = math.tanh %170 : vector<8x64xf32>
    %cst_63 = arith.constant dense<0.000000e+00> : vector<8x32xf32>
    %172 = tpu.matmul %171, %1, %cst_63 {dimension_numbers = #tpu.dot_dimension_numbers<[1], [0], [0], [1], [0, 0, 1, 1], [], []>} : vector<8x64xf32>, vector<64x32xf32>, vector<8x32xf32> -> vector<8x32xf32>
    %173 = arith.addf %172, %7 : vector<8x32xf32>
    %174 = vector.broadcast %150 : f32 to vector<8x32xf32>
    %175 = arith.mulf %174, %173 : vector<8x32xf32>
    %176 = arith.addf %146, %175 : vector<8x32xf32>
    %cst_64 = arith.constant dense<0.000000e+00> : vector<8x64xf32>
    %177 = tpu.matmul %176, %0, %cst_64 {dimension_numbers = #tpu.dot_dimension_numbers<[1], [0], [0], [1], [0, 0, 1, 1], [], []>} : vector<8x32xf32>, vector<32x64xf32>, vector<8x64xf32> -> vector<8x64xf32>
    %178 = arith.addf %177, %4 : vector<8x64xf32>
    %179 = math.tanh %178 : vector<8x64xf32>
    %cst_65 = arith.constant dense<0.000000e+00> : vector<8x32xf32>
    %180 = tpu.matmul %179, %1, %cst_65 {dimension_numbers = #tpu.dot_dimension_numbers<[1], [0], [0], [1], [0, 0, 1, 1], [], []>} : vector<8x64xf32>, vector<64x32xf32>, vector<8x32xf32> -> vector<8x32xf32>
    %181 = arith.addf %180, %7 : vector<8x32xf32>
    %cst_66 = arith.constant 6.000000e+00 : f32
    %182 = arith.divf %150, %cst_66 : f32
    %cst_67 = arith.constant 2.000000e+00 : f32
    %183 = vector.broadcast %cst_67 : f32 to vector<8x32xf32>
    %184 = arith.mulf %183, %164 : vector<8x32xf32>
    %185 = arith.addf %155, %184 : vector<8x32xf32>
    %cst_68 = arith.constant 2.000000e+00 : f32
    %186 = vector.broadcast %cst_68 : f32 to vector<8x32xf32>
    %187 = arith.mulf %186, %173 : vector<8x32xf32>
    %188 = arith.addf %185, %187 : vector<8x32xf32>
    %189 = arith.addf %188, %181 : vector<8x32xf32>
    %190 = vector.broadcast %182 : f32 to vector<8x32xf32>
    %191 = arith.mulf %190, %189 : vector<8x32xf32>
    %192 = arith.addf %146, %191 : vector<8x32xf32>
    %c0_69 = arith.constant 0 : index
    %c128 = arith.constant 128 : index
    %193 = vector.load %arg7[%c0_69, %c128] : memref<8x256xf32, #tpu.memory_space<vmem>>, vector<8x32xf32>
    tpu.vector_store %arg7[%c0_69, %c128], %192 {strides = array<i32>} : memref<8x256xf32, #tpu.memory_space<vmem>>, vector<8x32xf32>,
    %c5 = arith.constant 5 : index
    %194 = memref.load %arg1[%c5] : memref<8xf32, #tpu.memory_space<smem>>
    %c4_70 = arith.constant 4 : index
    %195 = memref.load %arg1[%c4_70] : memref<8xf32, #tpu.memory_space<smem>>
    %196 = arith.subf %194, %195 : f32
    %cst_71 = arith.constant dense<0.000000e+00> : vector<8x64xf32>
    %197 = tpu.matmul %192, %0, %cst_71 {dimension_numbers = #tpu.dot_dimension_numbers<[1], [0], [0], [1], [0, 0, 1, 1], [], []>} : vector<8x32xf32>, vector<32x64xf32>, vector<8x64xf32> -> vector<8x64xf32>
    %198 = arith.addf %197, %4 : vector<8x64xf32>
    %199 = math.tanh %198 : vector<8x64xf32>
    %cst_72 = arith.constant dense<0.000000e+00> : vector<8x32xf32>
    %200 = tpu.matmul %199, %1, %cst_72 {dimension_numbers = #tpu.dot_dimension_numbers<[1], [0], [0], [1], [0, 0, 1, 1], [], []>} : vector<8x64xf32>, vector<64x32xf32>, vector<8x32xf32> -> vector<8x32xf32>
    %201 = arith.addf %200, %7 : vector<8x32xf32>
    %cst_73 = arith.constant 5.000000e-01 : f32
    %202 = arith.mulf %cst_73, %196 : f32
    %203 = vector.broadcast %202 : f32 to vector<8x32xf32>
    %204 = arith.mulf %203, %201 : vector<8x32xf32>
    %205 = arith.addf %192, %204 : vector<8x32xf32>
    %cst_74 = arith.constant dense<0.000000e+00> : vector<8x64xf32>
    %206 = tpu.matmul %205, %0, %cst_74 {dimension_numbers = #tpu.dot_dimension_numbers<[1], [0], [0], [1], [0, 0, 1, 1], [], []>} : vector<8x32xf32>, vector<32x64xf32>, vector<8x64xf32> -> vector<8x64xf32>
    %207 = arith.addf %206, %4 : vector<8x64xf32>
    %208 = math.tanh %207 : vector<8x64xf32>
    %cst_75 = arith.constant dense<0.000000e+00> : vector<8x32xf32>
    %209 = tpu.matmul %208, %1, %cst_75 {dimension_numbers = #tpu.dot_dimension_numbers<[1], [0], [0], [1], [0, 0, 1, 1], [], []>} : vector<8x64xf32>, vector<64x32xf32>, vector<8x32xf32> -> vector<8x32xf32>
    %210 = arith.addf %209, %7 : vector<8x32xf32>
    %cst_76 = arith.constant 5.000000e-01 : f32
    %211 = arith.mulf %cst_76, %196 : f32
    %212 = vector.broadcast %211 : f32 to vector<8x32xf32>
    %213 = arith.mulf %212, %210 : vector<8x32xf32>
    %214 = arith.addf %192, %213 : vector<8x32xf32>
    %cst_77 = arith.constant dense<0.000000e+00> : vector<8x64xf32>
    %215 = tpu.matmul %214, %0, %cst_77 {dimension_numbers = #tpu.dot_dimension_numbers<[1], [0], [0], [1], [0, 0, 1, 1], [], []>} : vector<8x32xf32>, vector<32x64xf32>, vector<8x64xf32> -> vector<8x64xf32>
    %216 = arith.addf %215, %4 : vector<8x64xf32>
    %217 = math.tanh %216 : vector<8x64xf32>
    %cst_78 = arith.constant dense<0.000000e+00> : vector<8x32xf32>
    %218 = tpu.matmul %217, %1, %cst_78 {dimension_numbers = #tpu.dot_dimension_numbers<[1], [0], [0], [1], [0, 0, 1, 1], [], []>} : vector<8x64xf32>, vector<64x32xf32>, vector<8x32xf32> -> vector<8x32xf32>
    %219 = arith.addf %218, %7 : vector<8x32xf32>
    %220 = vector.broadcast %196 : f32 to vector<8x32xf32>
    %221 = arith.mulf %220, %219 : vector<8x32xf32>
    %222 = arith.addf %192, %221 : vector<8x32xf32>
    %cst_79 = arith.constant dense<0.000000e+00> : vector<8x64xf32>
    %223 = tpu.matmul %222, %0, %cst_79 {dimension_numbers = #tpu.dot_dimension_numbers<[1], [0], [0], [1], [0, 0, 1, 1], [], []>} : vector<8x32xf32>, vector<32x64xf32>, vector<8x64xf32> -> vector<8x64xf32>
    %224 = arith.addf %223, %4 : vector<8x64xf32>
    %225 = math.tanh %224 : vector<8x64xf32>
    %cst_80 = arith.constant dense<0.000000e+00> : vector<8x32xf32>
    %226 = tpu.matmul %225, %1, %cst_80 {dimension_numbers = #tpu.dot_dimension_numbers<[1], [0], [0], [1], [0, 0, 1, 1], [], []>} : vector<8x64xf32>, vector<64x32xf32>, vector<8x32xf32> -> vector<8x32xf32>
    %227 = arith.addf %226, %7 : vector<8x32xf32>
    %cst_81 = arith.constant 6.000000e+00 : f32
    %228 = arith.divf %196, %cst_81 : f32
    %cst_82 = arith.constant 2.000000e+00 : f32
    %229 = vector.broadcast %cst_82 : f32 to vector<8x32xf32>
    %230 = arith.mulf %229, %210 : vector<8x32xf32>
    %231 = arith.addf %201, %230 : vector<8x32xf32>
    %cst_83 = arith.constant 2.000000e+00 : f32
    %232 = vector.broadcast %cst_83 : f32 to vector<8x32xf32>
    %233 = arith.mulf %232, %219 : vector<8x32xf32>
    %234 = arith.addf %231, %233 : vector<8x32xf32>
    %235 = arith.addf %234, %227 : vector<8x32xf32>
    %236 = vector.broadcast %228 : f32 to vector<8x32xf32>
    %237 = arith.mulf %236, %235 : vector<8x32xf32>
    %238 = arith.addf %192, %237 : vector<8x32xf32>
    %c0_84 = arith.constant 0 : index
    %c160 = arith.constant 160 : index
    %239 = vector.load %arg7[%c0_84, %c160] : memref<8x256xf32, #tpu.memory_space<vmem>>, vector<8x32xf32>
    tpu.vector_store %arg7[%c0_84, %c160], %238 {strides = array<i32>} : memref<8x256xf32, #tpu.memory_space<vmem>>, vector<8x32xf32>,
    %c6 = arith.constant 6 : index
    %240 = memref.load %arg1[%c6] : memref<8xf32, #tpu.memory_space<smem>>
    %c5_85 = arith.constant 5 : index
    %241 = memref.load %arg1[%c5_85] : memref<8xf32, #tpu.memory_space<smem>>
    %242 = arith.subf %240, %241 : f32
    %cst_86 = arith.constant dense<0.000000e+00> : vector<8x64xf32>
    %243 = tpu.matmul %238, %0, %cst_86 {dimension_numbers = #tpu.dot_dimension_numbers<[1], [0], [0], [1], [0, 0, 1, 1], [], []>} : vector<8x32xf32>, vector<32x64xf32>, vector<8x64xf32> -> vector<8x64xf32>
    %244 = arith.addf %243, %4 : vector<8x64xf32>
    %245 = math.tanh %244 : vector<8x64xf32>
    %cst_87 = arith.constant dense<0.000000e+00> : vector<8x32xf32>
    %246 = tpu.matmul %245, %1, %cst_87 {dimension_numbers = #tpu.dot_dimension_numbers<[1], [0], [0], [1], [0, 0, 1, 1], [], []>} : vector<8x64xf32>, vector<64x32xf32>, vector<8x32xf32> -> vector<8x32xf32>
    %247 = arith.addf %246, %7 : vector<8x32xf32>
    %cst_88 = arith.constant 5.000000e-01 : f32
    %248 = arith.mulf %cst_88, %242 : f32
    %249 = vector.broadcast %248 : f32 to vector<8x32xf32>
    %250 = arith.mulf %249, %247 : vector<8x32xf32>
    %251 = arith.addf %238, %250 : vector<8x32xf32>
    %cst_89 = arith.constant dense<0.000000e+00> : vector<8x64xf32>
    %252 = tpu.matmul %251, %0, %cst_89 {dimension_numbers = #tpu.dot_dimension_numbers<[1], [0], [0], [1], [0, 0, 1, 1], [], []>} : vector<8x32xf32>, vector<32x64xf32>, vector<8x64xf32> -> vector<8x64xf32>
    %253 = arith.addf %252, %4 : vector<8x64xf32>
    %254 = math.tanh %253 : vector<8x64xf32>
    %cst_90 = arith.constant dense<0.000000e+00> : vector<8x32xf32>
    %255 = tpu.matmul %254, %1, %cst_90 {dimension_numbers = #tpu.dot_dimension_numbers<[1], [0], [0], [1], [0, 0, 1, 1], [], []>} : vector<8x64xf32>, vector<64x32xf32>, vector<8x32xf32> -> vector<8x32xf32>
    %256 = arith.addf %255, %7 : vector<8x32xf32>
    %cst_91 = arith.constant 5.000000e-01 : f32
    %257 = arith.mulf %cst_91, %242 : f32
    %258 = vector.broadcast %257 : f32 to vector<8x32xf32>
    %259 = arith.mulf %258, %256 : vector<8x32xf32>
    %260 = arith.addf %238, %259 : vector<8x32xf32>
    %cst_92 = arith.constant dense<0.000000e+00> : vector<8x64xf32>
    %261 = tpu.matmul %260, %0, %cst_92 {dimension_numbers = #tpu.dot_dimension_numbers<[1], [0], [0], [1], [0, 0, 1, 1], [], []>} : vector<8x32xf32>, vector<32x64xf32>, vector<8x64xf32> -> vector<8x64xf32>
    %262 = arith.addf %261, %4 : vector<8x64xf32>
    %263 = math.tanh %262 : vector<8x64xf32>
    %cst_93 = arith.constant dense<0.000000e+00> : vector<8x32xf32>
    %264 = tpu.matmul %263, %1, %cst_93 {dimension_numbers = #tpu.dot_dimension_numbers<[1], [0], [0], [1], [0, 0, 1, 1], [], []>} : vector<8x64xf32>, vector<64x32xf32>, vector<8x32xf32> -> vector<8x32xf32>
    %265 = arith.addf %264, %7 : vector<8x32xf32>
    %266 = vector.broadcast %242 : f32 to vector<8x32xf32>
    %267 = arith.mulf %266, %265 : vector<8x32xf32>
    %268 = arith.addf %238, %267 : vector<8x32xf32>
    %cst_94 = arith.constant dense<0.000000e+00> : vector<8x64xf32>
    %269 = tpu.matmul %268, %0, %cst_94 {dimension_numbers = #tpu.dot_dimension_numbers<[1], [0], [0], [1], [0, 0, 1, 1], [], []>} : vector<8x32xf32>, vector<32x64xf32>, vector<8x64xf32> -> vector<8x64xf32>
    %270 = arith.addf %269, %4 : vector<8x64xf32>
    %271 = math.tanh %270 : vector<8x64xf32>
    %cst_95 = arith.constant dense<0.000000e+00> : vector<8x32xf32>
    %272 = tpu.matmul %271, %1, %cst_95 {dimension_numbers = #tpu.dot_dimension_numbers<[1], [0], [0], [1], [0, 0, 1, 1], [], []>} : vector<8x64xf32>, vector<64x32xf32>, vector<8x32xf32> -> vector<8x32xf32>
    %273 = arith.addf %272, %7 : vector<8x32xf32>
    %cst_96 = arith.constant 6.000000e+00 : f32
    %274 = arith.divf %242, %cst_96 : f32
    %cst_97 = arith.constant 2.000000e+00 : f32
    %275 = vector.broadcast %cst_97 : f32 to vector<8x32xf32>
    %276 = arith.mulf %275, %256 : vector<8x32xf32>
    %277 = arith.addf %247, %276 : vector<8x32xf32>
    %cst_98 = arith.constant 2.000000e+00 : f32
    %278 = vector.broadcast %cst_98 : f32 to vector<8x32xf32>
    %279 = arith.mulf %278, %265 : vector<8x32xf32>
    %280 = arith.addf %277, %279 : vector<8x32xf32>
    %281 = arith.addf %280, %273 : vector<8x32xf32>
    %282 = vector.broadcast %274 : f32 to vector<8x32xf32>
    %283 = arith.mulf %282, %281 : vector<8x32xf32>
    %284 = arith.addf %238, %283 : vector<8x32xf32>
    %c0_99 = arith.constant 0 : index
    %c192 = arith.constant 192 : index
    %285 = vector.load %arg7[%c0_99, %c192] : memref<8x256xf32, #tpu.memory_space<vmem>>, vector<8x32xf32>
    tpu.vector_store %arg7[%c0_99, %c192], %284 {strides = array<i32>} : memref<8x256xf32, #tpu.memory_space<vmem>>, vector<8x32xf32>,
    %c7 = arith.constant 7 : index
    %286 = memref.load %arg1[%c7] : memref<8xf32, #tpu.memory_space<smem>>
    %c6_100 = arith.constant 6 : index
    %287 = memref.load %arg1[%c6_100] : memref<8xf32, #tpu.memory_space<smem>>
    %288 = arith.subf %286, %287 : f32
    %cst_101 = arith.constant dense<0.000000e+00> : vector<8x64xf32>
    %289 = tpu.matmul %284, %0, %cst_101 {dimension_numbers = #tpu.dot_dimension_numbers<[1], [0], [0], [1], [0, 0, 1, 1], [], []>} : vector<8x32xf32>, vector<32x64xf32>, vector<8x64xf32> -> vector<8x64xf32>
    %290 = arith.addf %289, %4 : vector<8x64xf32>
    %291 = math.tanh %290 : vector<8x64xf32>
    %cst_102 = arith.constant dense<0.000000e+00> : vector<8x32xf32>
    %292 = tpu.matmul %291, %1, %cst_102 {dimension_numbers = #tpu.dot_dimension_numbers<[1], [0], [0], [1], [0, 0, 1, 1], [], []>} : vector<8x64xf32>, vector<64x32xf32>, vector<8x32xf32> -> vector<8x32xf32>
    %293 = arith.addf %292, %7 : vector<8x32xf32>
    %cst_103 = arith.constant 5.000000e-01 : f32
    %294 = arith.mulf %cst_103, %288 : f32
    %295 = vector.broadcast %294 : f32 to vector<8x32xf32>
    %296 = arith.mulf %295, %293 : vector<8x32xf32>
    %297 = arith.addf %284, %296 : vector<8x32xf32>
    %cst_104 = arith.constant dense<0.000000e+00> : vector<8x64xf32>
    %298 = tpu.matmul %297, %0, %cst_104 {dimension_numbers = #tpu.dot_dimension_numbers<[1], [0], [0], [1], [0, 0, 1, 1], [], []>} : vector<8x32xf32>, vector<32x64xf32>, vector<8x64xf32> -> vector<8x64xf32>
    %299 = arith.addf %298, %4 : vector<8x64xf32>
    %300 = math.tanh %299 : vector<8x64xf32>
    %cst_105 = arith.constant dense<0.000000e+00> : vector<8x32xf32>
    %301 = tpu.matmul %300, %1, %cst_105 {dimension_numbers = #tpu.dot_dimension_numbers<[1], [0], [0], [1], [0, 0, 1, 1], [], []>} : vector<8x64xf32>, vector<64x32xf32>, vector<8x32xf32> -> vector<8x32xf32>
    %302 = arith.addf %301, %7 : vector<8x32xf32>
    %cst_106 = arith.constant 5.000000e-01 : f32
    %303 = arith.mulf %cst_106, %288 : f32
    %304 = vector.broadcast %303 : f32 to vector<8x32xf32>
    %305 = arith.mulf %304, %302 : vector<8x32xf32>
    %306 = arith.addf %284, %305 : vector<8x32xf32>
    %cst_107 = arith.constant dense<0.000000e+00> : vector<8x64xf32>
    %307 = tpu.matmul %306, %0, %cst_107 {dimension_numbers = #tpu.dot_dimension_numbers<[1], [0], [0], [1], [0, 0, 1, 1], [], []>} : vector<8x32xf32>, vector<32x64xf32>, vector<8x64xf32> -> vector<8x64xf32>
    %308 = arith.addf %307, %4 : vector<8x64xf32>
    %309 = math.tanh %308 : vector<8x64xf32>
    %cst_108 = arith.constant dense<0.000000e+00> : vector<8x32xf32>
    %310 = tpu.matmul %309, %1, %cst_108 {dimension_numbers = #tpu.dot_dimension_numbers<[1], [0], [0], [1], [0, 0, 1, 1], [], []>} : vector<8x64xf32>, vector<64x32xf32>, vector<8x32xf32> -> vector<8x32xf32>
    %311 = arith.addf %310, %7 : vector<8x32xf32>
    %312 = vector.broadcast %288 : f32 to vector<8x32xf32>
    %313 = arith.mulf %312, %311 : vector<8x32xf32>
    %314 = arith.addf %284, %313 : vector<8x32xf32>
    %cst_109 = arith.constant dense<0.000000e+00> : vector<8x64xf32>
    %315 = tpu.matmul %314, %0, %cst_109 {dimension_numbers = #tpu.dot_dimension_numbers<[1], [0], [0], [1], [0, 0, 1, 1], [], []>} : vector<8x32xf32>, vector<32x64xf32>, vector<8x64xf32> -> vector<8x64xf32>
    %316 = arith.addf %315, %4 : vector<8x64xf32>
    %317 = math.tanh %316 : vector<8x64xf32>
    %cst_110 = arith.constant dense<0.000000e+00> : vector<8x32xf32>
    %318 = tpu.matmul %317, %1, %cst_110 {dimension_numbers = #tpu.dot_dimension_numbers<[1], [0], [0], [1], [0, 0, 1, 1], [], []>} : vector<8x64xf32>, vector<64x32xf32>, vector<8x32xf32> -> vector<8x32xf32>
    %319 = arith.addf %318, %7 : vector<8x32xf32>
    %cst_111 = arith.constant 6.000000e+00 : f32
    %320 = arith.divf %288, %cst_111 : f32
    %cst_112 = arith.constant 2.000000e+00 : f32
    %321 = vector.broadcast %cst_112 : f32 to vector<8x32xf32>
    %322 = arith.mulf %321, %302 : vector<8x32xf32>
    %323 = arith.addf %293, %322 : vector<8x32xf32>
    %cst_113 = arith.constant 2.000000e+00 : f32
    %324 = vector.broadcast %cst_113 : f32 to vector<8x32xf32>
    %325 = arith.mulf %324, %311 : vector<8x32xf32>
    %326 = arith.addf %323, %325 : vector<8x32xf32>
    %327 = arith.addf %326, %319 : vector<8x32xf32>
    %328 = vector.broadcast %320 : f32 to vector<8x32xf32>
    %329 = arith.mulf %328, %327 : vector<8x32xf32>
    %330 = arith.addf %284, %329 : vector<8x32xf32>
    %c0_114 = arith.constant 0 : index
    %c224 = arith.constant 224 : index
    %331 = vector.load %arg7[%c0_114, %c224] : memref<8x256xf32, #tpu.memory_space<vmem>>, vector<8x32xf32>
    tpu.vector_store %arg7[%c0_114, %c224], %330 {strides = array<i32>} : memref<8x256xf32, #tpu.memory_space<vmem>>, vector<8x32xf32>,
    return
  }
  func.func @transform_0(%arg0: i32, %arg1: memref<8xf32, #tpu.memory_space<smem>>) -> (i32, i32) {
    %c0_i32 = arith.constant 0 : i32
    %c0_i32_0 = arith.constant 0 : i32
    return %arg0, %c0_i32 : i32, i32
  }
  func.func @transform_1(%arg0: i32, %arg1: memref<8xf32, #tpu.memory_space<smem>>) -> (i32, i32) {
    %c0_i32 = arith.constant 0 : i32
    %c0_i32_0 = arith.constant 0 : i32
    %c0_i32_1 = arith.constant 0 : i32
    return %c0_i32, %c0_i32_0 : i32, i32
  }
  func.func @transform_2(%arg0: i32, %arg1: memref<8xf32, #tpu.memory_space<smem>>) -> (i32, i32) {
    %c0_i32 = arith.constant 0 : i32
    %c0_i32_0 = arith.constant 0 : i32
    %c0_i32_1 = arith.constant 0 : i32
    return %c0_i32, %c0_i32_0 : i32, i32
  }
  func.func @transform_3(%arg0: i32, %arg1: memref<8xf32, #tpu.memory_space<smem>>) -> (i32, i32) {
    %c0_i32 = arith.constant 0 : i32
    %c0_i32_0 = arith.constant 0 : i32
    %c0_i32_1 = arith.constant 0 : i32
    return %c0_i32, %c0_i32_0 : i32, i32
  }
  func.func @transform_4(%arg0: i32, %arg1: memref<8xf32, #tpu.memory_space<smem>>) -> (i32, i32) {
    %c0_i32 = arith.constant 0 : i32
    %c0_i32_0 = arith.constant 0 : i32
    %c0_i32_1 = arith.constant 0 : i32
    return %c0_i32, %c0_i32_0 : i32, i32
  }
  func.func @transform_5(%arg0: i32, %arg1: memref<8xf32, #tpu.memory_space<smem>>) -> (i32, i32) {
    %c0_i32 = arith.constant 0 : i32
    %c0_i32_0 = arith.constant 0 : i32
    return %arg0, %c0_i32 : i32, i32
  }
}

</mosaic_0001>

<bundles_post_ra>
// kernel: tpu_custom_call.1
= control target key start
LH: loop header
LB: loop body
LE: loop exit
PB: predicated region body
PF: predicated region fallthrough
CT: control target
= control target key end

     0   :  { %s7107_s0 = inlined_call_operand.vmem [shape: f32[8], index: 0, kind: input, shape index: {}]   ;;  %s7108_s1 = inlined_call_operand.vmem [shape: f32[8,32], index: 1, kind: input, shape index: {}]   ;;  %s7109_s2 = inlined_call_operand.vmem [shape: f32[32,64], index: 2, kind: input, shape index: {}]   ;;  %s7110_s3 = inlined_call_operand.vmem [shape: f32[1,64], index: 3, kind: input, shape index: {}]   ;;  %s7111_s4 = inlined_call_operand.vmem [shape: f32[64,32], index: 4, kind: input, shape index: {}]   ;;  %s7112_s5 = inlined_call_operand.vmem [shape: f32[1,32], index: 5, kind: input, shape index: {}]   ;;  %s7113_s6 = inlined_call_operand.hbm [shape: f32[8,256], index: 6, kind: output, shape index: {}]  }
   0x1   :  { %s11_s23 = sshll.u32 %s7107_s0, 4  ;;  %s12_s23 = int_to_ptr.vmem [resolvable:$true] %s11_s23 }
   0x2   :  { %s6251_s24 = scalar_lea.vmem %s12_s23, 16  ;;  %p6256_p1 = scmp.lt.s32.totalorder %s12_s23, %s12_s23 }
   0x3   :  { %p6252_p0 = scmp.ne.s32.totalorder %s12_s23, %s6251_s24  ;;  %p6257_p2 = scmp.lt.s32.totalorder %s6251_s24, %s6251_s24 }
   0x5   :  { %p6258_p3 = por %p6257_p2, %p6256_p1 }
   0x7   :  { %p6259_p4 = pnand %p6258_p3, %p6252_p0 }
   0x9   :  { %6262 = shalt.err (!%p6259_p4)  }
   0xa   :  { %s6289_s25 = smov [#allocation3]  }
   0xb   :  { %14 = dma.vmem_to_smem %s12_s23, 16, %s6289_s25, [#allocation2] }
   0xc   :  { %6285 = dma.done.wait [#allocation2], 16 }
   0xd   :  { %6286 = vsyncadd [#allocation2], 4294967280 }
   0xe   :  { %16 = sfence }
   0xf   :  { %v28_v0 = vld [vmem:[%s7109_s2] sm:$0xff]  ;;  %v29_v1 = vld [vmem:[%s7109_s2 + $0x8] sm:$0xff]  ;;  %v30_v2 = vld [vmem:[%s7109_s2 + $0x10] sm:$0xff]  ;;  %v6290_v3 = vmov 0.0|0.0   ;;  %vm6291_vm0 = vmmov 0   ;;  %v6292_v6 = vmov 0.0  }
  0x10   :  { %5681 = vmatprep.subr.bf16.mxu1 %v6290_v3  ;;  %v6345_v4 = vpack.c.bf16 %v29_v1, %v28_v0  ;;  %v31_v5 = vld [vmem:[%s7109_s2 + $0x18] sm:$0xff]  ;;  %4849 = vmatprep.mubr.msk.f32.mxu1 %vm6291_vm0, %v6292_v6  ;;  %v6355_v7 = vld [vmem:[%s7108_s1] sm:$0xff]  ;;  %vm55_vm1 = vcmask 261120  }
  0x11   :  { %56 = vst.msk [vmem:[#allocation4] sm:$0xff] %vm55_vm1, %v6355_v7  ;;  %5699 = vmatprep.subr.bf16.mxu0 %v6290_v3  ;;  %4879 = vmatprep.mubr.msk.f32.mxu0 %vm6291_vm0, %v6292_v6 }
  0x12   :  { %17 = vsyncpa [#allocation5], 0  ;;  %5683 = vmatpush3.bf16.msra.mxu1 %v6345_v4  ;;  %v6363_v8 = vpack.c.bf16 %v31_v5, %v30_v2  ;;  %5701 = vmatpush3.bf16.msra.mxu0 %v6345_v4  ;;  %v32_v9 = vld [vmem:[%s7111_s4] sm:$0xff]  ;;  %v33_v10 = vld [vmem:[%s7111_s4 + $0x8] sm:$0xff]  ;;  %vm134_vm2 = vcmask 523264   ;;  %s58_s27 = sld [smem:[#allocation3]] }
  0x13   :  { %5684 = vmatprep.subr.bf16.mxu1 %v6290_v3  ;;  %5702 = vmatprep.subr.bf16.mxu0 %v6290_v3  ;;  %v6375_v11 = vpack.c.bf16 %v33_v10, %v32_v9  ;;  %v34_v12 = vld [vmem:[%s7111_s4 + $0x10] sm:$0xff]  ;;  %v35_v13 = vld [vmem:[%s7111_s4 + $0x18] sm:$0xff]  ;;  %v36_v15 = vld [vmem:[%s7111_s4 + $0x20] sm:$0xff]  ;;  %s6293_s8 = smov 32   ;;  %vm673_vm3 = vcmask 523520   ;;  %s6532_s9 = sld [smem:[#allocation3 + $0x2]] }
  0x14   :  { %v6392_v14 = vpack.c.bf16 %v35_v13, %v34_v12  ;;  %v37_v16 = vld [vmem:[%s7111_s4 + $0x28] sm:$0xff]  ;;  %v38_v18 = vld [vmem:[%s7111_s4 + $0x30] sm:$0xff]  ;;  %v39_v19 = vld [vmem:[%s7111_s4 + $0x38] sm:$0xff]  ;;  %s6429_s4 = sld [smem:[#allocation3 + $0x1]]  ;;  %s6294_s11 = smov 64   ;;  %vm1289_vm4 = vcmask 785920  }
  0x15   :  { %v6402_v17 = vpack.c.bf16 %v37_v16, %v36_v15  ;;  %v6411_v20 = vpack.c.bf16 %v39_v19, %v38_v18  ;;  %v6419_v21 = vld [vmem:[%s7110_s3] ss:$0 sm:$0xff]  ;;  %s6631_s12 = sld [smem:[#allocation3 + $0x3]]  ;;  %s6727_s16 = sld [smem:[#allocation3 + $0x4]]  ;;  %vm1905_vm5 = vcmask 1048320  }
  0x16   :  { %5686 = vmatpush3.bf16.msra.mxu1 %v6363_v8  ;;  %5704 = vmatpush3.bf16.msra.mxu0 %v6363_v8  ;;  %v6438_v26 = vld [vmem:[%s7112_s5] ss:$0 sm:$0xff]  ;;  %s6825_s20 = sld [smem:[#allocation3 + $0x5]]  ;;  %s6295_s26 = smov 96  }
  0x17   :  { %5687 = vmatprep.subr.bf16.mxu1 %v6290_v3  ;;  %5705 = vmatprep.subr.bf16.mxu0 %v6290_v3  ;;  %s4439_s0 = sld [smem:[#allocation3 + $0x7]] }
  0x19   :  { %4850 = vmatmul.mubr.msk.f32.vlgmr.msra.gmra.mrb[0].mxu1 %vm55_vm1, %v6355_v7 }
  0x1a   :  { %5689 = vmatpush3.bf16.msra.mxu1 %v6375_v11  ;;  %4868 = vmatprep.mubr.msk.f32.mxu1 %vm6291_vm0, %v6292_v6  ;;  %s6432_s28 = ssub.f32 %s6429_s4, %s58_s27 }
  0x1b   :  { %5690 = vmatprep.subr.bf16.mxu1 %v6290_v3  ;;  %s6536_s10 = ssub.f32 %s6532_s9, %s6429_s4  ;;  %s6937_s4 = sld [smem:[#allocation3 + $0x6]] }
  0x1c   :  { %s208_s29 = smul.f32 0.5, %s6432_s28  ;;  %v508_v48 = vstv %s6432_s28  ;;  %s6635_s13 = ssub.f32 %s6631_s12, %s6532_s9 }
  0x1d   :  { %s660_s7 = smul.f32 0.16666667, %s6432_s28  ;;  %s6731_s17 = ssub.f32 %s6727_s16, %s6631_s12 }
  0x1e   :  { %5692 = vmatpush3.bf16.msra.mxu1 %v6392_v14  ;;  %v209_v28 = vstv %s208_s29  ;;  %s824_s1 = smul.f32 0.5, %s6536_s10  ;;  %s6829_s21 = ssub.f32 %s6825_s20, %s6727_s16 }
  0x1f   :  { %5693 = vmatprep.subr.bf16.mxu1 %v6290_v3  ;;  %v666_v63 = vstv %s660_s7  ;;  %s1276_s2 = smul.f32 0.16666667, %s6536_s10  ;;  %s6296_s9 = smov [#allocation4]  }
  0x20   :  { %v825_v15 = vstv %s824_s1  ;;  %s1440_s14 = smul.f32 0.5, %s6635_s13 }
  0x21   :  { %s1892_s15 = smul.f32 0.16666667, %s6635_s13  ;;  %s6941_s27 = ssub.f32 %s6937_s4, %s6825_s20 }
  0x22   :  { %5695 = vmatpush3.bf16.msra.mxu1 %v6402_v17  ;;  %s2056_s18 = smul.f32 0.5, %s6731_s17  ;;  %s7037_s30 = ssub.f32 %s4439_s0, %s6937_s4 }
  0x23   :  { %5696 = vmatprep.subr.bf16.mxu1 %v6290_v3  ;;  %s2508_s19 = smul.f32 0.16666667, %s6731_s17 }
  0x24   :  { %s2668_s22 = smul.f32 0.5, %s6829_s21 }
  0x25   :  { %s3283_s28 = smul.f32 0.5, %s6941_s27 }
  0x26   :  { %5698 = vmatpush3.bf16.msra.mxu1 %v6411_v20  ;;  %s3735_s29 = smul.f32 0.16666667, %s6941_s27 }
  0x27   :  { %5717 = vmatprep.subr.bf16.mxu1 %v6290_v3  ;;  %s3898_s7 = smul.f32 0.5, %s7037_s30 }
  0xec   :  { %v129_v22 = vpop.f32.mrb[0].mxu1 }
  0xed   :  { %v130_v23 = vadd.f32 %v6419_v21, %v129_v22  ;;  %v4851_v24 = vpop.f32.mrb[1].mxu1 }
  0xef   :  { %6193 = vtanh.f32 %v130_v23 }
  0xf9   :  { %v6194_v25 = vpop.eup %6193 }
  0xfa   :  { %4869 = vmatmul.mubr.msk.f32.vlgmr.msra.gmra.mrb[2].mxu1 %vm134_vm2, %v6194_v25 }
  0xfb   :  { %5719 = vmatpush3.bf16.msra.mxu1 %v6345_v4  ;;  %4909 = vmatprep.mubr.msk.f32.mxu1 %vm6291_vm0, %v6292_v6 }
  0xfc   :  { %5720 = vmatprep.subr.bf16.mxu1 %v6290_v3 }
  0xff   :  { %5722 = vmatpush3.bf16.msra.mxu1 %v6363_v8 }
 0x100   :  { %5723 = vmatprep.subr.bf16.mxu1 %v6290_v3 }
 0x1cd   :  { %v204_v27 = vpop.f32.mrb[2].mxu1 }
 0x1ce   :  { %v205_v29 = vadd.f32 %v6438_v26, %v204_v27  ;;  %v4870_v30 = vpop.f32.mrb[3].mxu1 }
 0x1d0   :  { %v210_v31 = vmul.f32 %v209_v28, %v205_v29 }
 0x1d2   :  { %v211_v32 = vadd.f32 %v210_v31, %v6355_v7 }
 0x1d4   :  { %4880 = vmatmul.mubr.msk.f32.vlgmr.msra.gmra.mrb[0].mxu0 %vm55_vm1, %v211_v32 }
 0x1d5   :  { %5707 = vmatpush3.bf16.msra.mxu0 %v6375_v11  ;;  %4898 = vmatprep.mubr.msk.f32.mxu0 %vm6291_vm0, %v6292_v6 }
 0x1d6   :  { %5708 = vmatprep.subr.bf16.mxu0 %v6290_v3 }
 0x1d9   :  { %5710 = vmatpush3.bf16.msra.mxu0 %v6392_v14 }
 0x1da   :  { %5711 = vmatprep.subr.bf16.mxu0 %v6290_v3 }
 0x1dd   :  { %5713 = vmatpush3.bf16.msra.mxu0 %v6402_v17 }
 0x1de   :  { %5714 = vmatprep.subr.bf16.mxu0 %v6290_v3 }
 0x1e1   :  { %5716 = vmatpush3.bf16.msra.mxu0 %v6411_v20 }
 0x1e2   :  { %5735 = vmatprep.subr.bf16.mxu0 %v6290_v3 }
 0x2a7   :  { %v281_v33 = vpop.f32.mrb[0].mxu0 }
 0x2a8   :  { %v282_v34 = vadd.f32 %v6419_v21, %v281_v33  ;;  %v4881_v35 = vpop.f32.mrb[1].mxu0 }
 0x2aa   :  { %6195 = vtanh.f32 %v282_v34 }
 0x2b4   :  { %v6196_v36 = vpop.eup %6195 }
 0x2b5   :  { %4899 = vmatmul.mubr.msk.f32.vlgmr.msra.gmra.mrb[2].mxu0 %vm134_vm2, %v6196_v36 }
 0x2b6   :  { %5737 = vmatpush3.bf16.msra.mxu0 %v6345_v4  ;;  %4939 = vmatprep.mubr.msk.f32.mxu0 %vm6291_vm0, %v6292_v6 }
 0x2b7   :  { %5738 = vmatprep.subr.bf16.mxu0 %v6290_v3 }
 0x2ba   :  { %5740 = vmatpush3.bf16.msra.mxu0 %v6363_v8 }
 0x2bb   :  { %5741 = vmatprep.subr.bf16.mxu0 %v6290_v3 }
 0x388   :  { %v355_v37 = vpop.f32.mrb[2].mxu0 }
 0x389   :  { %v356_v38 = vadd.f32 %v6438_v26, %v355_v37  ;;  %v4900_v39 = vpop.f32.mrb[3].mxu0 }
 0x38a   :  { %v1124_v39 = vstv %s6536_s10  ;;  %s4370_s10 = sshll.u32 %s6296_s9, 4  ;;  %s4371_s10 = int_to_ptr.vmem [resolvable:$true] %s4370_s10 }
 0x38b   :  { %v359_v40 = vmul.f32 %v356_v38, %v209_v28  ;;  %v661_v46 = vmul.f32 2.0, %v356_v38  ;;  %s6263_s1 = scalar_lea.vmem %s4371_s10, 256  ;;  %p6268_p6 = scmp.lt.s32.totalorder %s4371_s10, %s4371_s10 }
 0x38c   :  { %p6264_p5 = scmp.ne.s32.totalorder %s4371_s10, %s6263_s1  ;;  %p6269_p7 = scmp.lt.s32.totalorder %s6263_s1, %s6263_s1 }
 0x38d   :  { %v360_v41 = vadd.f32 %v359_v40, %v6355_v7  ;;  %v662_v51 = vadd.f32 %v661_v46, %v205_v29 }
 0x38e   :  { %p6270_p8 = por %p6269_p7, %p6268_p6 }
 0x38f   :  { %4910 = vmatmul.mubr.msk.f32.vlgmr.msra.gmra.mrb[4].mxu1 %vm55_vm1, %v360_v41 }
 0x390   :  { %5725 = vmatpush3.bf16.msra.mxu1 %v6375_v11  ;;  %4928 = vmatprep.mubr.msk.f32.mxu1 %vm6291_vm0, %v6292_v6  ;;  %p6271_p9 = pnand %p6270_p8, %p6264_p5 }
 0x391   :  { %5726 = vmatprep.subr.bf16.mxu1 %v6290_v3 }
 0x394   :  { %5728 = vmatpush3.bf16.msra.mxu1 %v6392_v14 }
 0x395   :  { %5729 = vmatprep.subr.bf16.mxu1 %v6290_v3 }
 0x398   :  { %5731 = vmatpush3.bf16.msra.mxu1 %v6402_v17 }
 0x399   :  { %5732 = vmatprep.subr.bf16.mxu1 %v6290_v3 }
 0x39c   :  { %5734 = vmatpush3.bf16.msra.mxu1 %v6411_v20 }
 0x39d   :  { %5753 = vmatprep.subr.bf16.mxu1 %v6290_v3 }
 0x462   :  { %v430_v42 = vpop.f32.mrb[4].mxu1 }
 0x463   :  { %v431_v43 = vadd.f32 %v6419_v21, %v430_v42  ;;  %v4911_v44 = vpop.f32.mrb[5].mxu1 }
 0x465   :  { %6197 = vtanh.f32 %v431_v43 }
 0x46f   :  { %v6198_v45 = vpop.eup %6197 }
 0x470   :  { %4929 = vmatmul.mubr.msk.f32.vlgmr.msra.gmra.mrb[6].mxu1 %vm134_vm2, %v6198_v45 }
 0x471   :  { %5755 = vmatpush3.bf16.msra.mxu1 %v6345_v4  ;;  %4969 = vmatprep.mubr.msk.f32.mxu1 %vm6291_vm0, %v6292_v6 }
 0x472   :  { %5756 = vmatprep.subr.bf16.mxu1 %v6290_v3 }
 0x475   :  { %5758 = vmatpush3.bf16.msra.mxu1 %v6363_v8 }
 0x476   :  { %5759 = vmatprep.subr.bf16.mxu1 %v6290_v3 }
 0x543   :  { %v504_v47 = vpop.f32.mrb[6].mxu1 }
 0x544   :  { %v505_v49 = vadd.f32 %v6438_v26, %v504_v47  ;;  %v4930_v50 = vpop.f32.mrb[7].mxu1 }
 0x546   :  { %v509_v52 = vmul.f32 %v508_v48, %v505_v49  ;;  %v663_v53 = vmul.f32 2.0, %v505_v49 }
 0x548   :  { %v510_v54 = vadd.f32 %v509_v52, %v6355_v7  ;;  %v664_v55 = vadd.f32 %v663_v53, %v662_v51 }
 0x54a   :  { %4940 = vmatmul.mubr.msk.f32.vlgmr.msra.gmra.mrb[4].mxu0 %vm55_vm1, %v510_v54  ;;  %v1282_v54 = vstv %s1276_s2 }
 0x54b   :  { %5743 = vmatpush3.bf16.msra.mxu0 %v6375_v11  ;;  %4958 = vmatprep.mubr.msk.f32.mxu0 %vm6291_vm0, %v6292_v6 }
 0x54c   :  { %5744 = vmatprep.subr.bf16.mxu0 %v6290_v3 }
 0x54f   :  { %5746 = vmatpush3.bf16.msra.mxu0 %v6392_v14 }
 0x550   :  { %5747 = vmatprep.subr.bf16.mxu0 %v6290_v3 }
 0x553   :  { %5749 = vmatpush3.bf16.msra.mxu0 %v6402_v17 }
 0x554   :  { %5750 = vmatprep.subr.bf16.mxu0 %v6290_v3 }
 0x557   :  { %5752 = vmatpush3.bf16.msra.mxu0 %v6411_v20 }
 0x558   :  { %5771 = vmatprep.subr.bf16.mxu0 %v6290_v3 }
 0x61d   :  { %v580_v56 = vpop.f32.mrb[4].mxu0 }
 0x61e   :  { %v581_v57 = vadd.f32 %v6419_v21, %v580_v56  ;;  %v4941_v58 = vpop.f32.mrb[5].mxu0 }
 0x620   :  { %6199 = vtanh.f32 %v581_v57 }
 0x62a   :  { %v6200_v59 = vpop.eup %6199 }
 0x62b   :  { %4959 = vmatmul.mubr.msk.f32.vlgmr.msra.gmra.mrb[6].mxu0 %vm134_vm2, %v6200_v59 }
 0x62c   :  { %5773 = vmatpush3.bf16.msra.mxu0 %v6345_v4  ;;  %4999 = vmatprep.mubr.msk.f32.mxu0 %vm6291_vm0, %v6292_v6 }
 0x62d   :  { %5774 = vmatprep.subr.bf16.mxu0 %v6290_v3 }
 0x630   :  { %5776 = vmatpush3.bf16.msra.mxu0 %v6363_v8 }
 0x631   :  { %5777 = vmatprep.subr.bf16.mxu0 %v6290_v3 }
 0x6fe   :  { %v654_v60 = vpop.f32.mrb[6].mxu0 }
 0x6ff   :  { %v655_v61 = vadd.f32 %v6438_v26, %v654_v60  ;;  %v4960_v62 = vpop.f32.mrb[7].mxu0 }
 0x701   :  { %v665_v0 = vadd.f32 %v664_v55, %v655_v61 }
 0x703   :  { %v667_v1 = vmul.f32 %v666_v63, %v665_v0  ;;  %v1441_v0 = vstv %s1440_s14 }
 0x705   :  { %v6507_v2 = vadd.f32 %v667_v1, %v6355_v7 }
 0x707   :  { %670 = vrot.lane.b32.xlu0 %v6507_v2, %s6293_s8  ;;  %4970 = vmatmul.mubr.msk.f32.vlgmr.msra.gmra.mrb[8].mxu1 %vm55_vm1, %v6507_v2 }
 0x708   :  { %5761 = vmatpush3.bf16.msra.mxu1 %v6375_v11  ;;  %4988 = vmatprep.mubr.msk.f32.mxu1 %vm6291_vm0, %v6292_v6 }
 0x709   :  { %5762 = vmatprep.subr.bf16.mxu1 %v6290_v3 }
 0x70c   :  { %5764 = vmatpush3.bf16.msra.mxu1 %v6392_v14 }
 0x70d   :  { %5765 = vmatprep.subr.bf16.mxu1 %v6290_v3 }
 0x710   :  { %5767 = vmatpush3.bf16.msra.mxu1 %v6402_v17 }
 0x711   :  { %5768 = vmatprep.subr.bf16.mxu1 %v6290_v3 }
 0x714   :  { %5770 = vmatpush3.bf16.msra.mxu1 %v6411_v20 }
 0x715   :  { %5789 = vmatprep.subr.bf16.mxu1 %v6290_v3 }
 0x779   :  { %v671_v5 = vpop.permute.xlu0 %670 }
 0x77a   :  { %674 = vst.msk [vmem:[#allocation4] sm:$0xff] %vm673_vm3, %v671_v5 }
 0x7da   :  { %v746_v7 = vpop.f32.mrb[8].mxu1 }
 0x7db   :  { %v747_v9 = vadd.f32 %v6419_v21, %v746_v7  ;;  %v4971_v10 = vpop.f32.mrb[9].mxu1 }
 0x7dd   :  { %6201 = vtanh.f32 %v747_v9 }
 0x7e7   :  { %v6202_v12 = vpop.eup %6201 }
 0x7e8   :  { %4989 = vmatmul.mubr.msk.f32.vlgmr.msra.gmra.mrb[10].mxu1 %vm134_vm2, %v6202_v12 }
 0x7e9   :  { %5791 = vmatpush3.bf16.msra.mxu1 %v6345_v4  ;;  %5029 = vmatprep.mubr.msk.f32.mxu1 %vm6291_vm0, %v6292_v6 }
 0x7ea   :  { %5792 = vmatprep.subr.bf16.mxu1 %v6290_v3 }
 0x7ed   :  { %5794 = vmatpush3.bf16.msra.mxu1 %v6363_v8 }
 0x7ee   :  { %5795 = vmatprep.subr.bf16.mxu1 %v6290_v3 }
 0x8bb   :  { %v820_v13 = vpop.f32.mrb[10].mxu1 }
 0x8bc   :  { %v821_v16 = vadd.f32 %v6438_v26, %v820_v13  ;;  %v4990_v18 = vpop.f32.mrb[11].mxu1 }
 0x8be   :  { %v826_v19 = vmul.f32 %v825_v15, %v821_v16 }
 0x8c0   :  { %v827_v22 = vadd.f32 %v826_v19, %v6507_v2 }
 0x8c2   :  { %5000 = vmatmul.mubr.msk.f32.vlgmr.msra.gmra.mrb[8].mxu0 %vm55_vm1, %v827_v22 }
 0x8c3   :  { %5779 = vmatpush3.bf16.msra.mxu0 %v6375_v11  ;;  %5018 = vmatprep.mubr.msk.f32.mxu0 %vm6291_vm0, %v6292_v6 }
 0x8c4   :  { %5780 = vmatprep.subr.bf16.mxu0 %v6290_v3 }
 0x8c7   :  { %5782 = vmatpush3.bf16.msra.mxu0 %v6392_v14 }
 0x8c8   :  { %5783 = vmatprep.subr.bf16.mxu0 %v6290_v3 }
 0x8cb   :  { %5785 = vmatpush3.bf16.msra.mxu0 %v6402_v17 }
 0x8cc   :  { %5786 = vmatprep.subr.bf16.mxu0 %v6290_v3 }
 0x8cf   :  { %5788 = vmatpush3.bf16.msra.mxu0 %v6411_v20 }
 0x8d0   :  { %5807 = vmatprep.subr.bf16.mxu0 %v6290_v3 }
 0x995   :  { %v897_v23 = vpop.f32.mrb[8].mxu0 }
 0x996   :  { %v898_v24 = vadd.f32 %v6419_v21, %v897_v23  ;;  %v5001_v25 = vpop.f32.mrb[9].mxu0 }
 0x998   :  { %6203 = vtanh.f32 %v898_v24 }
 0x9a2   :  { %v6204_v27 = vpop.eup %6203 }
 0x9a3   :  { %5019 = vmatmul.mubr.msk.f32.vlgmr.msra.gmra.mrb[10].mxu0 %vm134_vm2, %v6204_v27 }
 0x9a4   :  { %5809 = vmatpush3.bf16.msra.mxu0 %v6345_v4  ;;  %5059 = vmatprep.mubr.msk.f32.mxu0 %vm6291_vm0, %v6292_v6 }
 0x9a5   :  { %5810 = vmatprep.subr.bf16.mxu0 %v6290_v3 }
 0x9a8   :  { %5812 = vmatpush3.bf16.msra.mxu0 %v6363_v8 }
 0x9a9   :  { %5813 = vmatprep.subr.bf16.mxu0 %v6290_v3 }
 0xa76   :  { %v971_v28 = vpop.f32.mrb[10].mxu0 }
 0xa77   :  { %v972_v29 = vadd.f32 %v6438_v26, %v971_v28  ;;  %v5020_v30 = vpop.f32.mrb[11].mxu0 }
 0xa78   :  { %v1740_v30 = vstv %s6635_s13 }
 0xa79   :  { %v975_v31 = vmul.f32 %v972_v29, %v825_v15  ;;  %v1277_v37 = vmul.f32 2.0, %v972_v29 }
 0xa7b   :  { %v976_v32 = vadd.f32 %v975_v31, %v6507_v2  ;;  %v1278_v42 = vadd.f32 %v1277_v37, %v821_v16 }
 0xa7d   :  { %5030 = vmatmul.mubr.msk.f32.vlgmr.msra.gmra.mrb[12].mxu1 %vm55_vm1, %v976_v32 }
 0xa7e   :  { %5797 = vmatpush3.bf16.msra.mxu1 %v6375_v11  ;;  %5048 = vmatprep.mubr.msk.f32.mxu1 %vm6291_vm0, %v6292_v6 }
 0xa7f   :  { %5798 = vmatprep.subr.bf16.mxu1 %v6290_v3 }
 0xa82   :  { %5800 = vmatpush3.bf16.msra.mxu1 %v6392_v14 }
 0xa83   :  { %5801 = vmatprep.subr.bf16.mxu1 %v6290_v3 }
 0xa86   :  { %5803 = vmatpush3.bf16.msra.mxu1 %v6402_v17 }
 0xa87   :  { %5804 = vmatprep.subr.bf16.mxu1 %v6290_v3 }
 0xa8a   :  { %5806 = vmatpush3.bf16.msra.mxu1 %v6411_v20 }
 0xa8b   :  { %5825 = vmatprep.subr.bf16.mxu1 %v6290_v3 }
 0xb50   :  { %v1046_v33 = vpop.f32.mrb[12].mxu1 }
 0xb51   :  { %v1047_v34 = vadd.f32 %v6419_v21, %v1046_v33  ;;  %v5031_v35 = vpop.f32.mrb[13].mxu1 }
 0xb53   :  { %6205 = vtanh.f32 %v1047_v34 }
 0xb5d   :  { %v6206_v36 = vpop.eup %6205 }
 0xb5e   :  { %5049 = vmatmul.mubr.msk.f32.vlgmr.msra.gmra.mrb[14].mxu1 %vm134_vm2, %v6206_v36 }
 0xb5f   :  { %5827 = vmatpush3.bf16.msra.mxu1 %v6345_v4  ;;  %5089 = vmatprep.mubr.msk.f32.mxu1 %vm6291_vm0, %v6292_v6 }
 0xb60   :  { %5828 = vmatprep.subr.bf16.mxu1 %v6290_v3 }
 0xb63   :  { %5830 = vmatpush3.bf16.msra.mxu1 %v6363_v8 }
 0xb64   :  { %5831 = vmatprep.subr.bf16.mxu1 %v6290_v3 }
 0xc31   :  { %v1120_v38 = vpop.f32.mrb[14].mxu1 }
 0xc32   :  { %v1121_v40 = vadd.f32 %v6438_v26, %v1120_v38  ;;  %v5050_v41 = vpop.f32.mrb[15].mxu1 }
 0xc34   :  { %v1125_v43 = vmul.f32 %v1124_v39, %v1121_v40  ;;  %v1279_v44 = vmul.f32 2.0, %v1121_v40 }
 0xc36   :  { %v1126_v45 = vadd.f32 %v1125_v43, %v6507_v2  ;;  %v1280_v46 = vadd.f32 %v1279_v44, %v1278_v42 }
 0xc38   :  { %5060 = vmatmul.mubr.msk.f32.vlgmr.msra.gmra.mrb[12].mxu0 %vm55_vm1, %v1126_v45  ;;  %v1898_v45 = vstv %s1892_s15 }
 0xc39   :  { %5815 = vmatpush3.bf16.msra.mxu0 %v6375_v11  ;;  %5078 = vmatprep.mubr.msk.f32.mxu0 %vm6291_vm0, %v6292_v6 }
 0xc3a   :  { %5816 = vmatprep.subr.bf16.mxu0 %v6290_v3 }
 0xc3d   :  { %5818 = vmatpush3.bf16.msra.mxu0 %v6392_v14 }
 0xc3e   :  { %5819 = vmatprep.subr.bf16.mxu0 %v6290_v3 }
 0xc41   :  { %5821 = vmatpush3.bf16.msra.mxu0 %v6402_v17 }
 0xc42   :  { %5822 = vmatprep.subr.bf16.mxu0 %v6290_v3 }
 0xc45   :  { %5824 = vmatpush3.bf16.msra.mxu0 %v6411_v20 }
 0xc46   :  { %5843 = vmatprep.subr.bf16.mxu0 %v6290_v3 }
 0xd0b   :  { %v1196_v47 = vpop.f32.mrb[12].mxu0 }
 0xd0c   :  { %v1197_v48 = vadd.f32 %v6419_v21, %v1196_v47  ;;  %v5061_v49 = vpop.f32.mrb[13].mxu0 }
 0xd0e   :  { %6207 = vtanh.f32 %v1197_v48 }
 0xd18   :  { %v6208_v50 = vpop.eup %6207 }
 0xd19   :  { %5079 = vmatmul.mubr.msk.f32.vlgmr.msra.gmra.mrb[14].mxu0 %vm134_vm2, %v6208_v50 }
 0xd1a   :  { %5845 = vmatpush3.bf16.msra.mxu0 %v6345_v4  ;;  %5119 = vmatprep.mubr.msk.f32.mxu0 %vm6291_vm0, %v6292_v6 }
 0xd1b   :  { %5846 = vmatprep.subr.bf16.mxu0 %v6290_v3 }
 0xd1e   :  { %5848 = vmatpush3.bf16.msra.mxu0 %v6363_v8 }
 0xd1f   :  { %5849 = vmatprep.subr.bf16.mxu0 %v6290_v3 }
 0xdec   :  { %v1270_v51 = vpop.f32.mrb[14].mxu0 }
 0xded   :  { %v1271_v52 = vadd.f32 %v6438_v26, %v1270_v51  ;;  %v5080_v53 = vpop.f32.mrb[15].mxu0 }
 0xdef   :  { %v1281_v55 = vadd.f32 %v1280_v46, %v1271_v52 }
 0xdf1   :  { %v1283_v56 = vmul.f32 %v1282_v54, %v1281_v55  ;;  %v2057_v54 = vstv %s2056_s18 }
 0xdf3   :  { %v6606_v57 = vadd.f32 %v1283_v56, %v6507_v2 }
 0xdf5   :  { %1286 = vrot.lane.b32.xlu1 %v6606_v57, %s6294_s11  ;;  %5090 = vmatmul.mubr.msk.f32.vlgmr.msra.gmra.mrb[16].mxu1 %vm55_vm1, %v6606_v57 }
 0xdf6   :  { %5833 = vmatpush3.bf16.msra.mxu1 %v6375_v11  ;;  %5108 = vmatprep.mubr.msk.f32.mxu1 %vm6291_vm0, %v6292_v6 }
 0xdf7   :  { %5834 = vmatprep.subr.bf16.mxu1 %v6290_v3 }
 0xdfa   :  { %5836 = vmatpush3.bf16.msra.mxu1 %v6392_v14 }
 0xdfb   :  { %5837 = vmatprep.subr.bf16.mxu1 %v6290_v3 }
 0xdfe   :  { %5839 = vmatpush3.bf16.msra.mxu1 %v6402_v17 }
 0xdff   :  { %5840 = vmatprep.subr.bf16.mxu1 %v6290_v3 }
 0xe02   :  { %5842 = vmatpush3.bf16.msra.mxu1 %v6411_v20 }
 0xe03   :  { %5861 = vmatprep.subr.bf16.mxu1 %v6290_v3 }
 0xe67   :  { %v1287_v58 = vpop.permute.xlu1 %1286 }
 0xe68   :  { %1290 = vst.msk [vmem:[#allocation4] sm:$0xff] %vm1289_vm4, %v1287_v58 }
 0xec8   :  { %v1362_v59 = vpop.f32.mrb[16].mxu1 }
 0xec9   :  { %v1363_v60 = vadd.f32 %v6419_v21, %v1362_v59  ;;  %v5091_v61 = vpop.f32.mrb[17].mxu1 }
 0xecb   :  { %6209 = vtanh.f32 %v1363_v60 }
 0xed5   :  { %v6210_v62 = vpop.eup %6209 }
 0xed6   :  { %5109 = vmatmul.mubr.msk.f32.vlgmr.msra.gmra.mrb[18].mxu1 %vm134_vm2, %v6210_v62 }
 0xed7   :  { %5863 = vmatpush3.bf16.msra.mxu1 %v6345_v4  ;;  %5149 = vmatprep.mubr.msk.f32.mxu1 %vm6291_vm0, %v6292_v6 }
 0xed8   :  { %5864 = vmatprep.subr.bf16.mxu1 %v6290_v3 }
 0xedb   :  { %5866 = vmatpush3.bf16.msra.mxu1 %v6363_v8 }
 0xedc   :  { %5867 = vmatprep.subr.bf16.mxu1 %v6290_v3 }
 0xfa9   :  { %v1436_v63 = vpop.f32.mrb[18].mxu1 }
 0xfaa   :  { %v1437_v1 = vadd.f32 %v6438_v26, %v1436_v63  ;;  %v5110_v2 = vpop.f32.mrb[19].mxu1 }
 0xfac   :  { %v1442_v5 = vmul.f32 %v1441_v0, %v1437_v1 }
 0xfae   :  { %v1443_v7 = vadd.f32 %v1442_v5, %v6606_v57 }
 0xfb0   :  { %5120 = vmatmul.mubr.msk.f32.vlgmr.msra.gmra.mrb[16].mxu0 %vm55_vm1, %v1443_v7 }
 0xfb1   :  { %5851 = vmatpush3.bf16.msra.mxu0 %v6375_v11  ;;  %5138 = vmatprep.mubr.msk.f32.mxu0 %vm6291_vm0, %v6292_v6 }
 0xfb2   :  { %5852 = vmatprep.subr.bf16.mxu0 %v6290_v3 }
 0xfb5   :  { %5854 = vmatpush3.bf16.msra.mxu0 %v6392_v14 }
 0xfb6   :  { %5855 = vmatprep.subr.bf16.mxu0 %v6290_v3 }
 0xfb9   :  { %5857 = vmatpush3.bf16.msra.mxu0 %v6402_v17 }
 0xfba   :  { %5858 = vmatprep.subr.bf16.mxu0 %v6290_v3 }
 0xfbd   :  { %5860 = vmatpush3.bf16.msra.mxu0 %v6411_v20 }
 0xfbe   :  { %5879 = vmatprep.subr.bf16.mxu0 %v6290_v3 }
0x1083   :  { %v1513_v9 = vpop.f32.mrb[16].mxu0 }
0x1084   :  { %v1514_v10 = vadd.f32 %v6419_v21, %v1513_v9  ;;  %v5121_v12 = vpop.f32.mrb[17].mxu0 }
0x1086   :  { %6211 = vtanh.f32 %v1514_v10 }
0x1090   :  { %v6212_v13 = vpop.eup %6211 }
0x1091   :  { %5139 = vmatmul.mubr.msk.f32.vlgmr.msra.gmra.mrb[18].mxu0 %vm134_vm2, %v6212_v13 }
0x1092   :  { %5881 = vmatpush3.bf16.msra.mxu0 %v6345_v4  ;;  %5179 = vmatprep.mubr.msk.f32.mxu0 %vm6291_vm0, %v6292_v6 }
0x1093   :  { %5882 = vmatprep.subr.bf16.mxu0 %v6290_v3 }
0x1096   :  { %5884 = vmatpush3.bf16.msra.mxu0 %v6363_v8 }
0x1097   :  { %5885 = vmatprep.subr.bf16.mxu0 %v6290_v3 }
0x1164   :  { %v1587_v15 = vpop.f32.mrb[18].mxu0 }
0x1165   :  { %v1588_v16 = vadd.f32 %v6438_v26, %v1587_v15  ;;  %v5140_v18 = vpop.f32.mrb[19].mxu0 }
0x1167   :  { %v1591_v19 = vmul.f32 %v1588_v16, %v1441_v0  ;;  %v1893_v28 = vmul.f32 2.0, %v1588_v16  ;;  %v2356_v16 = vstv %s6731_s17 }
0x1169   :  { %v1592_v22 = vadd.f32 %v1591_v19, %v6606_v57  ;;  %v1894_v33 = vadd.f32 %v1893_v28, %v1437_v1 }
0x116b   :  { %5150 = vmatmul.mubr.msk.f32.vlgmr.msra.gmra.mrb[20].mxu1 %vm55_vm1, %v1592_v22 }
0x116c   :  { %5869 = vmatpush3.bf16.msra.mxu1 %v6375_v11  ;;  %5168 = vmatprep.mubr.msk.f32.mxu1 %vm6291_vm0, %v6292_v6 }
0x116d   :  { %5870 = vmatprep.subr.bf16.mxu1 %v6290_v3 }
0x1170   :  { %5872 = vmatpush3.bf16.msra.mxu1 %v6392_v14 }
0x1171   :  { %5873 = vmatprep.subr.bf16.mxu1 %v6290_v3 }
0x1174   :  { %5875 = vmatpush3.bf16.msra.mxu1 %v6402_v17 }
0x1175   :  { %5876 = vmatprep.subr.bf16.mxu1 %v6290_v3 }
0x1178   :  { %5878 = vmatpush3.bf16.msra.mxu1 %v6411_v20 }
0x1179   :  { %5897 = vmatprep.subr.bf16.mxu1 %v6290_v3 }
0x123e   :  { %v1662_v23 = vpop.f32.mrb[20].mxu1 }
0x123f   :  { %v1663_v24 = vadd.f32 %v6419_v21, %v1662_v23  ;;  %v5151_v25 = vpop.f32.mrb[21].mxu1 }
0x1241   :  { %6213 = vtanh.f32 %v1663_v24 }
0x124b   :  { %v6214_v27 = vpop.eup %6213 }
0x124c   :  { %5169 = vmatmul.mubr.msk.f32.vlgmr.msra.gmra.mrb[22].mxu1 %vm134_vm2, %v6214_v27 }
0x124d   :  { %5899 = vmatpush3.bf16.msra.mxu1 %v6345_v4  ;;  %5209 = vmatprep.mubr.msk.f32.mxu1 %vm6291_vm0, %v6292_v6 }
0x124e   :  { %5900 = vmatprep.subr.bf16.mxu1 %v6290_v3 }
0x1251   :  { %5902 = vmatpush3.bf16.msra.mxu1 %v6363_v8 }
0x1252   :  { %5903 = vmatprep.subr.bf16.mxu1 %v6290_v3 }
0x131f   :  { %v1736_v29 = vpop.f32.mrb[22].mxu1 }
0x1320   :  { %v1737_v31 = vadd.f32 %v6438_v26, %v1736_v29  ;;  %v5170_v32 = vpop.f32.mrb[23].mxu1 }
0x1322   :  { %v1741_v34 = vmul.f32 %v1740_v30, %v1737_v31  ;;  %v1895_v35 = vmul.f32 2.0, %v1737_v31 }
0x1324   :  { %v1742_v36 = vadd.f32 %v1741_v34, %v6606_v57  ;;  %v1896_v37 = vadd.f32 %v1895_v35, %v1894_v33  ;;  %v2514_v35 = vstv %s2508_s19 }
0x1326   :  { %5180 = vmatmul.mubr.msk.f32.vlgmr.msra.gmra.mrb[20].mxu0 %vm55_vm1, %v1742_v36 }
0x1327   :  { %5887 = vmatpush3.bf16.msra.mxu0 %v6375_v11  ;;  %5198 = vmatprep.mubr.msk.f32.mxu0 %vm6291_vm0, %v6292_v6 }
0x1328   :  { %5888 = vmatprep.subr.bf16.mxu0 %v6290_v3 }
0x132b   :  { %5890 = vmatpush3.bf16.msra.mxu0 %v6392_v14 }
0x132c   :  { %5891 = vmatprep.subr.bf16.mxu0 %v6290_v3 }
0x132f   :  { %5893 = vmatpush3.bf16.msra.mxu0 %v6402_v17 }
0x1330   :  { %5894 = vmatprep.subr.bf16.mxu0 %v6290_v3 }
0x1333   :  { %5896 = vmatpush3.bf16.msra.mxu0 %v6411_v20 }
0x1334   :  { %5915 = vmatprep.subr.bf16.mxu0 %v6290_v3 }
0x13f9   :  { %v1812_v38 = vpop.f32.mrb[20].mxu0 }
0x13fa   :  { %v1813_v39 = vadd.f32 %v6419_v21, %v1812_v38  ;;  %v5181_v40 = vpop.f32.mrb[21].mxu0 }
0x13fc   :  { %6215 = vtanh.f32 %v1813_v39 }
0x1406   :  { %v6216_v41 = vpop.eup %6215 }
0x1407   :  { %5199 = vmatmul.mubr.msk.f32.vlgmr.msra.gmra.mrb[22].mxu0 %vm134_vm2, %v6216_v41 }
0x1408   :  { %5917 = vmatpush3.bf16.msra.mxu0 %v6345_v4  ;;  %5239 = vmatprep.mubr.msk.f32.mxu0 %vm6291_vm0, %v6292_v6 }
0x1409   :  { %5918 = vmatprep.subr.bf16.mxu0 %v6290_v3 }
0x140c   :  { %5920 = vmatpush3.bf16.msra.mxu0 %v6363_v8 }
0x140d   :  { %5921 = vmatprep.subr.bf16.mxu0 %v6290_v3 }
0x14da   :  { %v1886_v42 = vpop.f32.mrb[22].mxu0 }
0x14db   :  { %v1887_v43 = vadd.f32 %v6438_v26, %v1886_v42  ;;  %v5200_v44 = vpop.f32.mrb[23].mxu0 }
0x14dc   :  { %v2669_v44 = vstv %s2668_s22 }
0x14dd   :  { %v1897_v46 = vadd.f32 %v1896_v37, %v1887_v43 }
0x14df   :  { %v1899_v47 = vmul.f32 %v1898_v45, %v1897_v46 }
0x14e1   :  { %v6705_v48 = vadd.f32 %v1899_v47, %v6606_v57 }
0x14e3   :  { %5210 = vmatmul.mubr.msk.f32.vlgmr.msra.gmra.mrb[24].mxu1 %vm55_vm1, %v6705_v48 }
0x14e4   :  { %5905 = vmatpush3.bf16.msra.mxu1 %v6375_v11  ;;  %5228 = vmatprep.mubr.msk.f32.mxu1 %vm6291_vm0, %v6292_v6 }
0x14e5   :  { %5906 = vmatprep.subr.bf16.mxu1 %v6290_v3 }
0x14e8   :  { %5908 = vmatpush3.bf16.msra.mxu1 %v6392_v14 }
0x14e9   :  { %5909 = vmatprep.subr.bf16.mxu1 %v6290_v3 }
0x14ec   :  { %5911 = vmatpush3.bf16.msra.mxu1 %v6402_v17 }
0x14ed   :  { %5912 = vmatprep.subr.bf16.mxu1 %v6290_v3 }
0x14f0   :  { %5914 = vmatpush3.bf16.msra.mxu1 %v6411_v20 }
0x14f1   :  { %5933 = vmatprep.subr.bf16.mxu1 %v6290_v3 }
0x15b6   :  { %v1978_v49 = vpop.f32.mrb[24].mxu1 }
0x15b7   :  { %v1979_v50 = vadd.f32 %v6419_v21, %v1978_v49  ;;  %v5211_v51 = vpop.f32.mrb[25].mxu1 }
0x15b9   :  { %6217 = vtanh.f32 %v1979_v50 }
0x15c3   :  { %v6218_v52 = vpop.eup %6217 }
0x15c4   :  { %5229 = vmatmul.mubr.msk.f32.vlgmr.msra.gmra.mrb[26].mxu1 %vm134_vm2, %v6218_v52 }
0x15c5   :  { %5935 = vmatpush3.bf16.msra.mxu1 %v6345_v4  ;;  %5269 = vmatprep.mubr.msk.f32.mxu1 %vm6291_vm0, %v6292_v6 }
0x15c6   :  { %5936 = vmatprep.subr.bf16.mxu1 %v6290_v3 }
0x15c9   :  { %5938 = vmatpush3.bf16.msra.mxu1 %v6363_v8 }
0x15ca   :  { %5939 = vmatprep.subr.bf16.mxu1 %v6290_v3 }
0x1697   :  { %v2052_v53 = vpop.f32.mrb[26].mxu1 }
0x1698   :  { %v2053_v55 = vadd.f32 %v6438_v26, %v2052_v53  ;;  %v5230_v56 = vpop.f32.mrb[27].mxu1 }
0x169a   :  { %v2058_v57 = vmul.f32 %v2057_v54, %v2053_v55 }
0x169c   :  { %v2059_v58 = vadd.f32 %v2058_v57, %v6705_v48 }
0x169e   :  { %5240 = vmatmul.mubr.msk.f32.vlgmr.msra.gmra.mrb[24].mxu0 %vm55_vm1, %v2059_v58  ;;  %v6869_v58 = vld [vmem:[%s7110_s3] ss:$0 sm:$0xff] }
0x169f   :  { %5923 = vmatpush3.bf16.msra.mxu0 %v6375_v11  ;;  %5258 = vmatprep.mubr.msk.f32.mxu0 %vm6291_vm0, %v6292_v6 }
0x16a0   :  { %5924 = vmatprep.subr.bf16.mxu0 %v6290_v3 }
0x16a3   :  { %5926 = vmatpush3.bf16.msra.mxu0 %v6392_v14 }
0x16a4   :  { %5927 = vmatprep.subr.bf16.mxu0 %v6290_v3 }
0x16a7   :  { %5929 = vmatpush3.bf16.msra.mxu0 %v6402_v17 }
0x16a8   :  { %5930 = vmatprep.subr.bf16.mxu0 %v6290_v3 }
0x16ab   :  { %5932 = vmatpush3.bf16.msra.mxu0 %v6411_v20 }
0x16ac   :  { %5951 = vmatprep.subr.bf16.mxu0 %v6290_v3 }
0x1771   :  { %v2129_v59 = vpop.f32.mrb[24].mxu0 }
0x1772   :  { %v2130_v60 = vadd.f32 %v6419_v21, %v2129_v59  ;;  %v5241_v61 = vpop.f32.mrb[25].mxu0 }
0x1774   :  { %6219 = vtanh.f32 %v2130_v60 }
0x177e   :  { %v6220_v62 = vpop.eup %6219 }
0x177f   :  { %5259 = vmatmul.mubr.msk.f32.vlgmr.msra.gmra.mrb[26].mxu0 %vm134_vm2, %v6220_v62 }
0x1780   :  { %5953 = vmatpush3.bf16.msra.mxu0 %v6345_v4  ;;  %5299 = vmatprep.mubr.msk.f32.mxu0 %vm6291_vm0, %v6292_v6 }
0x1781   :  { %5954 = vmatprep.subr.bf16.mxu0 %v6290_v3 }
0x1784   :  { %5956 = vmatpush3.bf16.msra.mxu0 %v6363_v8 }
0x1785   :  { %5957 = vmatprep.subr.bf16.mxu0 %v6290_v3 }
0x1852   :  { %v2203_v63 = vpop.f32.mrb[26].mxu0 }
0x1853   :  { %v2204_v0 = vadd.f32 %v6438_v26, %v2203_v63  ;;  %v5260_v1 = vpop.f32.mrb[27].mxu0 }
0x1854   :  { %v6883_v1 = vld [vmem:[%s7112_s5] ss:$0 sm:$0xff]  ;;  %s3120_s5 = smul.f32 0.16666667, %s6829_s21 }
0x1855   :  { %v2207_v2 = vmul.f32 %v2204_v0, %v2057_v54  ;;  %v2509_v13 = vmul.f32 2.0, %v2204_v0  ;;  %v2968_v0 = vstv %s6829_s21 }
0x1857   :  { %v2208_v5 = vadd.f32 %v2207_v2, %v6705_v48  ;;  %v2510_v22 = vadd.f32 %v2509_v13, %v2053_v55 }
0x1859   :  { %5270 = vmatmul.mubr.msk.f32.vlgmr.msra.gmra.mrb[28].mxu1 %vm55_vm1, %v2208_v5 }
0x185a   :  { %5941 = vmatpush3.bf16.msra.mxu1 %v6375_v11  ;;  %5288 = vmatprep.mubr.msk.f32.mxu1 %vm6291_vm0, %v6292_v6 }
0x185b   :  { %5942 = vmatprep.subr.bf16.mxu1 %v6290_v3 }
0x185e   :  { %5944 = vmatpush3.bf16.msra.mxu1 %v6392_v14 }
0x185f   :  { %5945 = vmatprep.subr.bf16.mxu1 %v6290_v3 }
0x1862   :  { %5947 = vmatpush3.bf16.msra.mxu1 %v6402_v17 }
0x1863   :  { %5948 = vmatprep.subr.bf16.mxu1 %v6290_v3 }
0x1866   :  { %5950 = vmatpush3.bf16.msra.mxu1 %v6411_v20 }
0x1867   :  { %5969 = vmatprep.subr.bf16.mxu1 %v6290_v3 }
0x192c   :  { %v2278_v7 = vpop.f32.mrb[28].mxu1 }
0x192d   :  { %v2279_v9 = vadd.f32 %v6419_v21, %v2278_v7  ;;  %v5271_v10 = vpop.f32.mrb[29].mxu1 }
0x192f   :  { %6221 = vtanh.f32 %v2279_v9 }
0x1939   :  { %v6222_v12 = vpop.eup %6221 }
0x193a   :  { %5289 = vmatmul.mubr.msk.f32.vlgmr.msra.gmra.mrb[30].mxu1 %vm134_vm2, %v6222_v12 }
0x193b   :  { %5971 = vmatpush3.bf16.msra.mxu1 %v6345_v4  ;;  %5329 = vmatprep.mubr.msk.f32.mxu1 %vm6291_vm0, %v6292_v6 }
0x193c   :  { %5972 = vmatprep.subr.bf16.mxu1 %v6290_v3 }
0x193f   :  { %5974 = vmatpush3.bf16.msra.mxu1 %v6363_v8 }
0x1940   :  { %5975 = vmatprep.subr.bf16.mxu1 %v6290_v3 }
0x1a0d   :  { %v2352_v15 = vpop.f32.mrb[30].mxu1 }
0x1a0e   :  { %v2353_v18 = vadd.f32 %v6438_v26, %v2352_v15  ;;  %v5290_v19 = vpop.f32.mrb[31].mxu1 }
0x1a10   :  { %v2357_v23 = vmul.f32 %v2356_v16, %v2353_v18  ;;  %v2511_v24 = vmul.f32 2.0, %v2353_v18 }
0x1a12   :  { %v2358_v25 = vadd.f32 %v2357_v23, %v6705_v48  ;;  %v2512_v27 = vadd.f32 %v2511_v24, %v2510_v22 }
0x1a14   :  { %5300 = vmatmul.mubr.msk.f32.vlgmr.msra.gmra.mrb[28].mxu0 %vm55_vm1, %v2358_v25  ;;  %v3126_v25 = vstv %s3120_s5 }
0x1a15   :  { %5959 = vmatpush3.bf16.msra.mxu0 %v6375_v11  ;;  %5318 = vmatprep.mubr.msk.f32.mxu0 %vm6291_vm0, %v6292_v6 }
0x1a16   :  { %5960 = vmatprep.subr.bf16.mxu0 %v6290_v3 }
0x1a19   :  { %5962 = vmatpush3.bf16.msra.mxu0 %v6392_v14 }
0x1a1a   :  { %5963 = vmatprep.subr.bf16.mxu0 %v6290_v3 }
0x1a1d   :  { %5965 = vmatpush3.bf16.msra.mxu0 %v6402_v17 }
0x1a1e   :  { %5966 = vmatprep.subr.bf16.mxu0 %v6290_v3 }
0x1a21   :  { %5968 = vmatpush3.bf16.msra.mxu0 %v6411_v20 }
0x1a22   :  { %5987 = vmatprep.subr.bf16.mxu0 %v6290_v3 }
0x1ae7   :  { %v2428_v28 = vpop.f32.mrb[28].mxu0 }
0x1ae8   :  { %v2429_v29 = vadd.f32 %v6419_v21, %v2428_v28  ;;  %v5301_v30 = vpop.f32.mrb[29].mxu0 }
0x1aea   :  { %6223 = vtanh.f32 %v2429_v29 }
0x1af4   :  { %v6224_v31 = vpop.eup %6223 }
0x1af5   :  { %5319 = vmatmul.mubr.msk.f32.vlgmr.msra.gmra.mrb[30].mxu0 %vm134_vm2, %v6224_v31 }
0x1af6   :  { %5989 = vmatpush3.bf16.msra.mxu0 %v6345_v4  ;;  %5359 = vmatprep.mubr.msk.f32.mxu0 %vm6291_vm0, %v6292_v6 }
0x1af7   :  { %5990 = vmatprep.subr.bf16.mxu0 %v6290_v3 }
0x1afa   :  { %5992 = vmatpush3.bf16.msra.mxu0 %v6363_v8 }
0x1afb   :  { %5993 = vmatprep.subr.bf16.mxu0 %v6290_v3 }
0x1bc8   :  { %v2502_v32 = vpop.f32.mrb[30].mxu0 }
0x1bc9   :  { %v2503_v33 = vadd.f32 %v6438_v26, %v2502_v32  ;;  %v5320_v34 = vpop.f32.mrb[31].mxu0 }
0x1bcb   :  { %v2513_v36 = vadd.f32 %v2512_v27, %v2503_v33 }
0x1bcd   :  { %v2515_v37 = vmul.f32 %v2514_v35, %v2513_v36  ;;  %v3284_v36 = vstv %s3283_s28 }
0x1bcf   :  { %v6801_v38 = vadd.f32 %v2515_v37, %v6705_v48 }
0x1bd1   :  { %2517 = vst.msk [vmem:[#allocation4 + $0x8] sm:$0xff] %vm55_vm1, %v6801_v38  ;;  %5330 = vmatmul.mubr.msk.f32.vlgmr.msra.gmra.mrb[32].mxu1 %vm55_vm1, %v6801_v38 }
0x1bd2   :  { %5977 = vmatpush3.bf16.msra.mxu1 %v6375_v11  ;;  %5348 = vmatprep.mubr.msk.f32.mxu1 %vm6291_vm0, %v6292_v6 }
0x1bd3   :  { %5978 = vmatprep.subr.bf16.mxu1 %v6290_v3 }
0x1bd6   :  { %5980 = vmatpush3.bf16.msra.mxu1 %v6392_v14 }
0x1bd7   :  { %5981 = vmatprep.subr.bf16.mxu1 %v6290_v3 }
0x1bda   :  { %5983 = vmatpush3.bf16.msra.mxu1 %v6402_v17 }
0x1bdb   :  { %5984 = vmatprep.subr.bf16.mxu1 %v6290_v3 }
0x1bde   :  { %5986 = vmatpush3.bf16.msra.mxu1 %v6411_v20 }
0x1bdf   :  { %6005 = vmatprep.subr.bf16.mxu1 %v6290_v3 }
0x1ca4   :  { %v2590_v39 = vpop.f32.mrb[32].mxu1 }
0x1ca5   :  { %v2591_v40 = vadd.f32 %v6419_v21, %v2590_v39  ;;  %v5331_v41 = vpop.f32.mrb[33].mxu1 }
0x1ca7   :  { %6225 = vtanh.f32 %v2591_v40 }
0x1cb1   :  { %v6226_v42 = vpop.eup %6225 }
0x1cb2   :  { %5349 = vmatmul.mubr.msk.f32.vlgmr.msra.gmra.mrb[34].mxu1 %vm134_vm2, %v6226_v42 }
0x1cb3   :  { %6007 = vmatpush3.bf16.msra.mxu1 %v6345_v4  ;;  %5389 = vmatprep.mubr.msk.f32.mxu1 %vm6291_vm0, %v6292_v6 }
0x1cb4   :  { %6008 = vmatprep.subr.bf16.mxu1 %v6290_v3 }
0x1cb7   :  { %6010 = vmatpush3.bf16.msra.mxu1 %v6363_v8 }
0x1cb8   :  { %6011 = vmatprep.subr.bf16.mxu1 %v6290_v3 }
0x1d85   :  { %v2664_v43 = vpop.f32.mrb[34].mxu1 }
0x1d86   :  { %v2665_v45 = vadd.f32 %v6438_v26, %v2664_v43  ;;  %v5350_v46 = vpop.f32.mrb[35].mxu1 }
0x1d88   :  { %v2670_v47 = vmul.f32 %v2669_v44, %v2665_v45 }
0x1d8a   :  { %v2671_v49 = vadd.f32 %v2670_v47, %v6801_v38 }
0x1d8c   :  { %5360 = vmatmul.mubr.msk.f32.vlgmr.msra.gmra.mrb[32].mxu0 %vm55_vm1, %v2671_v49 }
0x1d8d   :  { %5995 = vmatpush3.bf16.msra.mxu0 %v6375_v11  ;;  %5378 = vmatprep.mubr.msk.f32.mxu0 %vm6291_vm0, %v6292_v6 }
0x1d8e   :  { %5996 = vmatprep.subr.bf16.mxu0 %v6290_v3 }
0x1d91   :  { %5998 = vmatpush3.bf16.msra.mxu0 %v6392_v14 }
0x1d92   :  { %5999 = vmatprep.subr.bf16.mxu0 %v6290_v3 }
0x1d95   :  { %6001 = vmatpush3.bf16.msra.mxu0 %v6402_v17 }
0x1d96   :  { %6002 = vmatprep.subr.bf16.mxu0 %v6290_v3 }
0x1d99   :  { %6004 = vmatpush3.bf16.msra.mxu0 %v6411_v20 }
0x1d9a   :  { %6023 = vmatprep.subr.bf16.mxu0 %v6290_v3 }
0x1e5f   :  { %v2741_v50 = vpop.f32.mrb[32].mxu0 }
0x1e60   :  { %v2742_v51 = vadd.f32 %v6419_v21, %v2741_v50  ;;  %v5361_v52 = vpop.f32.mrb[33].mxu0 }
0x1e62   :  { %6227 = vtanh.f32 %v2742_v51 }
0x1e6c   :  { %v6228_v53 = vpop.eup %6227 }
0x1e6d   :  { %5379 = vmatmul.mubr.msk.f32.vlgmr.msra.gmra.mrb[34].mxu0 %vm134_vm2, %v6228_v53 }
0x1e6e   :  { %6025 = vmatpush3.bf16.msra.mxu0 %v6345_v4  ;;  %5419 = vmatprep.mubr.msk.f32.mxu0 %vm6291_vm0, %v6292_v6 }
0x1e6f   :  { %6026 = vmatprep.subr.bf16.mxu0 %v6290_v3 }
0x1e72   :  { %6028 = vmatpush3.bf16.msra.mxu0 %v6363_v8 }
0x1e73   :  { %6029 = vmatprep.subr.bf16.mxu0 %v6290_v3 }
0x1f40   :  { %v2815_v54 = vpop.f32.mrb[34].mxu0 }
0x1f41   :  { %v2816_v55 = vadd.f32 %v6438_v26, %v2815_v54  ;;  %v5380_v21 = vpop.f32.mrb[35].mxu0 }
0x1f43   :  { %v2819_v56 = vmul.f32 %v2816_v55, %v2669_v44  ;;  %v3121_v62 = vmul.f32 2.0, %v2816_v55 }
0x1f45   :  { %v2820_v57 = vadd.f32 %v2819_v56, %v6801_v38  ;;  %v3122_v7 = vadd.f32 %v3121_v62, %v2665_v45  ;;  %v3583_v56 = vstv %s6941_s27 }
0x1f47   :  { %5390 = vmatmul.mubr.msk.f32.vlgmr.msra.gmra.mrb[36].mxu1 %vm55_vm1, %v2820_v57 }
0x1f48   :  { %6013 = vmatpush3.bf16.msra.mxu1 %v6375_v11  ;;  %5408 = vmatprep.mubr.msk.f32.mxu1 %vm6291_vm0, %v6292_v6 }
0x1f49   :  { %6014 = vmatprep.subr.bf16.mxu1 %v6290_v3 }
0x1f4c   :  { %6016 = vmatpush3.bf16.msra.mxu1 %v6392_v14 }
0x1f4d   :  { %6017 = vmatprep.subr.bf16.mxu1 %v6290_v3 }
0x1f50   :  { %6019 = vmatpush3.bf16.msra.mxu1 %v6402_v17 }
0x1f51   :  { %6020 = vmatprep.subr.bf16.mxu1 %v6290_v3 }
0x1f54   :  { %6022 = vmatpush3.bf16.msra.mxu1 %v6411_v20 }
0x1f55   :  { %6041 = vmatprep.subr.bf16.mxu1 %v6290_v3 }
0x201a   :  { %v2890_v26 = vpop.f32.mrb[36].mxu1 }
0x201b   :  { %v2891_v59 = vadd.f32 %v6869_v58, %v2890_v26  ;;  %v5391_v60 = vpop.f32.mrb[37].mxu1 }
0x201d   :  { %6229 = vtanh.f32 %v2891_v59 }
0x2027   :  { %v6230_v61 = vpop.eup %6229 }
0x2028   :  { %5409 = vmatmul.mubr.msk.f32.vlgmr.msra.gmra.mrb[38].mxu1 %vm134_vm2, %v6230_v61 }
0x2029   :  { %6043 = vmatpush3.bf16.msra.mxu1 %v6345_v4  ;;  %5449 = vmatprep.mubr.msk.f32.mxu1 %vm6291_vm0, %v6292_v6 }
0x202a   :  { %6044 = vmatprep.subr.bf16.mxu1 %v6290_v3 }
0x202d   :  { %6046 = vmatpush3.bf16.msra.mxu1 %v6363_v8 }
0x202e   :  { %6047 = vmatprep.subr.bf16.mxu1 %v6290_v3 }
0x20fb   :  { %v2964_v63 = vpop.f32.mrb[38].mxu1 }
0x20fc   :  { %v2965_v2 = vadd.f32 %v6883_v1, %v2964_v63  ;;  %v5410_v5 = vpop.f32.mrb[39].mxu1 }
0x20fe   :  { %v2969_v9 = vmul.f32 %v2968_v0, %v2965_v2  ;;  %v3123_v10 = vmul.f32 2.0, %v2965_v2 }
0x2100   :  { %v2970_v12 = vadd.f32 %v2969_v9, %v6801_v38  ;;  %v3124_v13 = vadd.f32 %v3123_v10, %v3122_v7 }
0x2102   :  { %5420 = vmatmul.mubr.msk.f32.vlgmr.msra.gmra.mrb[36].mxu0 %vm55_vm1, %v2970_v12 }
0x2103   :  { %6031 = vmatpush3.bf16.msra.mxu0 %v6375_v11  ;;  %5438 = vmatprep.mubr.msk.f32.mxu0 %vm6291_vm0, %v6292_v6 }
0x2104   :  { %6032 = vmatprep.subr.bf16.mxu0 %v6290_v3 }
0x2107   :  { %6034 = vmatpush3.bf16.msra.mxu0 %v6392_v14 }
0x2108   :  { %6035 = vmatprep.subr.bf16.mxu0 %v6290_v3 }
0x210b   :  { %6037 = vmatpush3.bf16.msra.mxu0 %v6402_v17 }
0x210c   :  { %6038 = vmatprep.subr.bf16.mxu0 %v6290_v3 }
0x210f   :  { %6040 = vmatpush3.bf16.msra.mxu0 %v6411_v20 }
0x2110   :  { %6059 = vmatprep.subr.bf16.mxu0 %v6290_v3 }
0x21d5   :  { %v3040_v15 = vpop.f32.mrb[36].mxu0 }
0x21d6   :  { %v3041_v16 = vadd.f32 %v6869_v58, %v3040_v15  ;;  %v5421_v18 = vpop.f32.mrb[37].mxu0 }
0x21d8   :  { %6231 = vtanh.f32 %v3041_v16 }
0x21e2   :  { %v6232_v19 = vpop.eup %6231 }
0x21e3   :  { %5439 = vmatmul.mubr.msk.f32.vlgmr.msra.gmra.mrb[38].mxu0 %vm134_vm2, %v6232_v19 }
0x21e4   :  { %6061 = vmatpush3.bf16.msra.mxu0 %v6345_v4  ;;  %5479 = vmatprep.mubr.msk.f32.mxu0 %vm6291_vm0, %v6292_v6 }
0x21e5   :  { %6062 = vmatprep.subr.bf16.mxu0 %v6290_v3 }
0x21e8   :  { %6064 = vmatpush3.bf16.msra.mxu0 %v6363_v8 }
0x21e9   :  { %6065 = vmatprep.subr.bf16.mxu0 %v6290_v3 }
0x22b6   :  { %v3114_v22 = vpop.f32.mrb[38].mxu0 }
0x22b7   :  { %v3115_v23 = vadd.f32 %v6883_v1, %v3114_v22  ;;  %v5440_v24 = vpop.f32.mrb[39].mxu0 }
0x22b9   :  { %v3125_v27 = vadd.f32 %v3124_v13, %v3115_v23  ;;  %v3741_v13 = vstv %s3735_s29 }
0x22bb   :  { %v3127_v28 = vmul.f32 %v3126_v25, %v3125_v27 }
0x22bd   :  { %v6909_v29 = vadd.f32 %v3127_v28, %v6801_v38  ;;  %v3899_v28 = vstv %s3898_s7 }
0x22bf   :  { %3130 = vrot.lane.b32.xlu0 %v6909_v29, %s6293_s8  ;;  %5450 = vmatmul.mubr.msk.f32.vlgmr.msra.gmra.mrb[40].mxu1 %vm55_vm1, %v6909_v29  ;;  %s4350_s8 = smul.f32 0.16666667, %s7037_s30 }
0x22c0   :  { %6049 = vmatpush3.bf16.msra.mxu1 %v6375_v11  ;;  %5468 = vmatprep.mubr.msk.f32.mxu1 %vm6291_vm0, %v6292_v6 }
0x22c1   :  { %6050 = vmatprep.subr.bf16.mxu1 %v6290_v3 }
0x22c3   :  { %1902 = vrot.lane.b32.xlu0 %v6705_v48, %s6295_s26 }
0x22c4   :  { %6052 = vmatpush3.bf16.msra.mxu1 %v6392_v14 }
0x22c5   :  { %6053 = vmatprep.subr.bf16.mxu1 %v6290_v3 }
0x22c8   :  { %6055 = vmatpush3.bf16.msra.mxu1 %v6402_v17 }
0x22c9   :  { %6056 = vmatprep.subr.bf16.mxu1 %v6290_v3 }
0x22cc   :  { %6058 = vmatpush3.bf16.msra.mxu1 %v6411_v20 }
0x22cd   :  { %6077 = vmatprep.subr.bf16.mxu1 %v6290_v3 }
0x2331   :  { %v3131_v30 = vpop.permute.xlu0 %3130 }
0x2332   :  { %3133 = vst.msk [vmem:[#allocation4 + $0x8] sm:$0xff] %vm673_vm3, %v3131_v30 }
0x2335   :  { %v1903_v31 = vpop.permute.xlu0 %1902 }
0x2336   :  { %1906 = vst.msk [vmem:[#allocation4] sm:$0xff] %vm1905_vm5, %v1903_v31 }
0x2392   :  { %v3205_v48 = vpop.f32.mrb[40].mxu1 }
0x2393   :  { %v3206_v32 = vadd.f32 %v6869_v58, %v3205_v48  ;;  %v5451_v33 = vpop.f32.mrb[41].mxu1 }
0x2395   :  { %6233 = vtanh.f32 %v3206_v32 }
0x239f   :  { %v6234_v34 = vpop.eup %6233 }
0x23a0   :  { %5469 = vmatmul.mubr.msk.f32.vlgmr.msra.gmra.mrb[42].mxu1 %vm134_vm2, %v6234_v34 }
0x23a1   :  { %6079 = vmatpush3.bf16.msra.mxu1 %v6345_v4  ;;  %5509 = vmatprep.mubr.msk.f32.mxu1 %vm6291_vm0, %v6292_v6 }
0x23a2   :  { %6080 = vmatprep.subr.bf16.mxu1 %v6290_v3 }
0x23a5   :  { %6082 = vmatpush3.bf16.msra.mxu1 %v6363_v8 }
0x23a6   :  { %6083 = vmatprep.subr.bf16.mxu1 %v6290_v3 }
0x2473   :  { %v3279_v35 = vpop.f32.mrb[42].mxu1 }
0x2474   :  { %v3280_v37 = vadd.f32 %v6883_v1, %v3279_v35  ;;  %v5470_v38 = vpop.f32.mrb[43].mxu1 }
0x2476   :  { %v3285_v39 = vmul.f32 %v3284_v36, %v3280_v37 }
0x2478   :  { %v3286_v40 = vadd.f32 %v3285_v39, %v6909_v29 }
0x247a   :  { %5480 = vmatmul.mubr.msk.f32.vlgmr.msra.gmra.mrb[40].mxu0 %vm55_vm1, %v3286_v40 }
0x247b   :  { %6067 = vmatpush3.bf16.msra.mxu0 %v6375_v11  ;;  %5498 = vmatprep.mubr.msk.f32.mxu0 %vm6291_vm0, %v6292_v6 }
0x247c   :  { %6068 = vmatprep.subr.bf16.mxu0 %v6290_v3 }
0x247f   :  { %6070 = vmatpush3.bf16.msra.mxu0 %v6392_v14 }
0x2480   :  { %6071 = vmatprep.subr.bf16.mxu0 %v6290_v3 }
0x2483   :  { %6073 = vmatpush3.bf16.msra.mxu0 %v6402_v17 }
0x2484   :  { %6074 = vmatprep.subr.bf16.mxu0 %v6290_v3 }
0x2487   :  { %6076 = vmatpush3.bf16.msra.mxu0 %v6411_v20 }
0x2488   :  { %6095 = vmatprep.subr.bf16.mxu0 %v6290_v3 }
0x254d   :  { %v3356_v41 = vpop.f32.mrb[40].mxu0 }
0x254e   :  { %v3357_v42 = vadd.f32 %v6869_v58, %v3356_v41  ;;  %v5481_v43 = vpop.f32.mrb[41].mxu0 }
0x2550   :  { %6235 = vtanh.f32 %v3357_v42 }
0x255a   :  { %v6236_v44 = vpop.eup %6235 }
0x255b   :  { %5499 = vmatmul.mubr.msk.f32.vlgmr.msra.gmra.mrb[42].mxu0 %vm134_vm2, %v6236_v44 }
0x255c   :  { %6097 = vmatpush3.bf16.msra.mxu0 %v6345_v4  ;;  %5539 = vmatprep.mubr.msk.f32.mxu0 %vm6291_vm0, %v6292_v6 }
0x255d   :  { %6098 = vmatprep.subr.bf16.mxu0 %v6290_v3 }
0x2560   :  { %6100 = vmatpush3.bf16.msra.mxu0 %v6363_v8 }
0x2561   :  { %6101 = vmatprep.subr.bf16.mxu0 %v6290_v3 }
0x262e   :  { %v3430_v45 = vpop.f32.mrb[42].mxu0 }
0x262f   :  { %v3431_v46 = vadd.f32 %v6883_v1, %v3430_v45  ;;  %v5500_v47 = vpop.f32.mrb[43].mxu0  ;;  %v4198_v45 = vstv %s7037_s30 }
0x2631   :  { %v3434_v49 = vmul.f32 %v3431_v46, %v3284_v36  ;;  %v3736_v55 = vmul.f32 2.0, %v3431_v46 }
0x2633   :  { %v3435_v50 = vadd.f32 %v3434_v49, %v6909_v29  ;;  %v3737_v59 = vadd.f32 %v3736_v55, %v3280_v37 }
0x2635   :  { %5510 = vmatmul.mubr.msk.f32.vlgmr.msra.gmra.mrb[44].mxu1 %vm55_vm1, %v3435_v50 }
0x2636   :  { %6085 = vmatpush3.bf16.msra.mxu1 %v6375_v11  ;;  %5528 = vmatprep.mubr.msk.f32.mxu1 %vm6291_vm0, %v6292_v6 }
0x2637   :  { %6086 = vmatprep.subr.bf16.mxu1 %v6290_v3 }
0x263a   :  { %6088 = vmatpush3.bf16.msra.mxu1 %v6392_v14 }
0x263b   :  { %6089 = vmatprep.subr.bf16.mxu1 %v6290_v3 }
0x263e   :  { %6091 = vmatpush3.bf16.msra.mxu1 %v6402_v17 }
0x263f   :  { %6092 = vmatprep.subr.bf16.mxu1 %v6290_v3 }
0x2642   :  { %6094 = vmatpush3.bf16.msra.mxu1 %v6411_v20 }
0x2643   :  { %6113 = vmatprep.subr.bf16.mxu1 %v6290_v3 }
0x2708   :  { %v3505_v51 = vpop.f32.mrb[44].mxu1 }
0x2709   :  { %v3506_v52 = vadd.f32 %v6869_v58, %v3505_v51  ;;  %v5511_v53 = vpop.f32.mrb[45].mxu1 }
0x270b   :  { %6237 = vtanh.f32 %v3506_v52 }
0x2715   :  { %v6238_v54 = vpop.eup %6237 }
0x2716   :  { %5529 = vmatmul.mubr.msk.f32.vlgmr.msra.gmra.mrb[46].mxu1 %vm134_vm2, %v6238_v54 }
0x2717   :  { %6115 = vmatpush3.bf16.msra.mxu1 %v6345_v4  ;;  %5569 = vmatprep.mubr.msk.f32.mxu1 %vm6291_vm0, %v6292_v6 }
0x2718   :  { %6116 = vmatprep.subr.bf16.mxu1 %v6290_v3 }
0x271b   :  { %6118 = vmatpush3.bf16.msra.mxu1 %v6363_v8 }
0x271c   :  { %6119 = vmatprep.subr.bf16.mxu1 %v6290_v3 }
0x27e9   :  { %v3579_v21 = vpop.f32.mrb[46].mxu1 }
0x27ea   :  { %v3580_v57 = vadd.f32 %v6883_v1, %v3579_v21  ;;  %v5530_v26 = vpop.f32.mrb[47].mxu1 }
0x27ec   :  { %v3584_v60 = vmul.f32 %v3583_v56, %v3580_v57  ;;  %v3738_v61 = vmul.f32 2.0, %v3580_v57  ;;  %v4356_v57 = vstv %s4350_s8 }
0x27ee   :  { %v3585_v62 = vadd.f32 %v3584_v60, %v6909_v29  ;;  %v3739_v63 = vadd.f32 %v3738_v61, %v3737_v59 }
0x27f0   :  { %5540 = vmatmul.mubr.msk.f32.vlgmr.msra.gmra.mrb[44].mxu0 %vm55_vm1, %v3585_v62 }
0x27f1   :  { %6103 = vmatpush3.bf16.msra.mxu0 %v6375_v11  ;;  %5558 = vmatprep.mubr.msk.f32.mxu0 %vm6291_vm0, %v6292_v6 }
0x27f2   :  { %6104 = vmatprep.subr.bf16.mxu0 %v6290_v3 }
0x27f5   :  { %6106 = vmatpush3.bf16.msra.mxu0 %v6392_v14 }
0x27f6   :  { %6107 = vmatprep.subr.bf16.mxu0 %v6290_v3 }
0x27f9   :  { %6109 = vmatpush3.bf16.msra.mxu0 %v6402_v17 }
0x27fa   :  { %6110 = vmatprep.subr.bf16.mxu0 %v6290_v3 }
0x27fd   :  { %6112 = vmatpush3.bf16.msra.mxu0 %v6411_v20 }
0x27fe   :  { %6131 = vmatprep.subr.bf16.mxu0 %v6290_v3 }
0x28c3   :  { %v3655_v0 = vpop.f32.mrb[44].mxu0 }
0x28c4   :  { %v3656_v2 = vadd.f32 %v6869_v58, %v3655_v0  ;;  %v5541_v5 = vpop.f32.mrb[45].mxu0 }
0x28c6   :  { %6239 = vtanh.f32 %v3656_v2 }
0x28d0   :  { %v6240_v7 = vpop.eup %6239 }
0x28d1   :  { %5559 = vmatmul.mubr.msk.f32.vlgmr.msra.gmra.mrb[46].mxu0 %vm134_vm2, %v6240_v7 }
0x28d2   :  { %6133 = vmatpush3.bf16.msra.mxu0 %v6345_v4  ;;  %5599 = vmatprep.mubr.msk.f32.mxu0 %vm6291_vm0, %v6292_v6 }
0x28d3   :  { %6134 = vmatprep.subr.bf16.mxu0 %v6290_v3 }
0x28d6   :  { %6136 = vmatpush3.bf16.msra.mxu0 %v6363_v8 }
0x28d7   :  { %6137 = vmatprep.subr.bf16.mxu0 %v6290_v3 }
0x29a4   :  { %v3729_v9 = vpop.f32.mrb[46].mxu0 }
0x29a5   :  { %v3730_v10 = vadd.f32 %v6883_v1, %v3729_v9  ;;  %v5560_v12 = vpop.f32.mrb[47].mxu0 }
0x29a7   :  { %v3740_v15 = vadd.f32 %v3739_v63, %v3730_v10 }
0x29a9   :  { %v3742_v16 = vmul.f32 %v3741_v13, %v3740_v15 }
0x29ab   :  { %v7011_v18 = vadd.f32 %v3742_v16, %v6909_v29 }
0x29ad   :  { %3745 = vrot.lane.b32.xlu1 %v7011_v18, %s6294_s11  ;;  %5570 = vmatmul.mubr.msk.f32.vlgmr.msra.gmra.mrb[48].mxu1 %vm55_vm1, %v7011_v18 }
0x29ae   :  { %6121 = vmatpush3.bf16.msra.mxu1 %v6375_v11  ;;  %5588 = vmatprep.mubr.msk.f32.mxu1 %vm6291_vm0, %v6292_v6 }
0x29af   :  { %6122 = vmatprep.subr.bf16.mxu1 %v6290_v3 }
0x29b2   :  { %6124 = vmatpush3.bf16.msra.mxu1 %v6392_v14 }
0x29b3   :  { %6125 = vmatprep.subr.bf16.mxu1 %v6290_v3 }
0x29b6   :  { %6127 = vmatpush3.bf16.msra.mxu1 %v6402_v17 }
0x29b7   :  { %6128 = vmatprep.subr.bf16.mxu1 %v6290_v3 }
0x29ba   :  { %6130 = vmatpush3.bf16.msra.mxu1 %v6411_v20 }
0x29bb   :  { %6149 = vmatprep.subr.bf16.mxu1 %v6290_v3 }
0x2a1f   :  { %v3746_v19 = vpop.permute.xlu1 %3745 }
0x2a20   :  { %3748 = vst.msk [vmem:[#allocation4 + $0x8] sm:$0xff] %vm1289_vm4, %v3746_v19 }
0x2a80   :  { %v3820_v22 = vpop.f32.mrb[48].mxu1 }
0x2a81   :  { %v3821_v23 = vadd.f32 %v6869_v58, %v3820_v22  ;;  %v5571_v24 = vpop.f32.mrb[49].mxu1 }
0x2a83   :  { %6241 = vtanh.f32 %v3821_v23 }
0x2a8d   :  { %v6242_v25 = vpop.eup %6241 }
0x2a8e   :  { %5589 = vmatmul.mubr.msk.f32.vlgmr.msra.gmra.mrb[50].mxu1 %vm134_vm2, %v6242_v25 }
0x2a8f   :  { %6151 = vmatpush3.bf16.msra.mxu1 %v6345_v4  ;;  %5629 = vmatprep.mubr.msk.f32.mxu1 %vm6291_vm0, %v6292_v6 }
0x2a90   :  { %6152 = vmatprep.subr.bf16.mxu1 %v6290_v3 }
0x2a93   :  { %6154 = vmatpush3.bf16.msra.mxu1 %v6363_v8 }
0x2a94   :  { %6155 = vmatprep.subr.bf16.mxu1 %v6290_v3 }
0x2b61   :  { %v3894_v27 = vpop.f32.mrb[50].mxu1 }
0x2b62   :  { %v3895_v29 = vadd.f32 %v6883_v1, %v3894_v27  ;;  %v5590_v30 = vpop.f32.mrb[51].mxu1 }
0x2b64   :  { %v3900_v31 = vmul.f32 %v3899_v28, %v3895_v29 }
0x2b66   :  { %v3901_v48 = vadd.f32 %v3900_v31, %v7011_v18 }
0x2b68   :  { %5600 = vmatmul.mubr.msk.f32.vlgmr.msra.gmra.mrb[48].mxu0 %vm55_vm1, %v3901_v48 }
0x2b69   :  { %6139 = vmatpush3.bf16.msra.mxu0 %v6375_v11  ;;  %5618 = vmatprep.mubr.msk.f32.mxu0 %vm6291_vm0, %v6292_v6 }
0x2b6a   :  { %6140 = vmatprep.subr.bf16.mxu0 %v6290_v3 }
0x2b6d   :  { %6142 = vmatpush3.bf16.msra.mxu0 %v6392_v14 }
0x2b6e   :  { %6143 = vmatprep.subr.bf16.mxu0 %v6290_v3 }
0x2b71   :  { %6145 = vmatpush3.bf16.msra.mxu0 %v6402_v17 }
0x2b72   :  { %6146 = vmatprep.subr.bf16.mxu0 %v6290_v3 }
0x2b75   :  { %6148 = vmatpush3.bf16.msra.mxu0 %v6411_v20 }
0x2b76   :  { %6167 = vmatprep.subr.bf16.mxu0 %v6290_v3 }
0x2c3b   :  { %v3971_v32 = vpop.f32.mrb[48].mxu0 }
0x2c3c   :  { %v3972_v33 = vadd.f32 %v6869_v58, %v3971_v32  ;;  %v5601_v34 = vpop.f32.mrb[49].mxu0 }
0x2c3e   :  { %6243 = vtanh.f32 %v3972_v33 }
0x2c48   :  { %v6244_v35 = vpop.eup %6243 }
0x2c49   :  { %5619 = vmatmul.mubr.msk.f32.vlgmr.msra.gmra.mrb[50].mxu0 %vm134_vm2, %v6244_v35 }
0x2c4a   :  { %6169 = vmatpush3.bf16.msra.mxu0 %v6345_v4  ;;  %5659 = vmatprep.mubr.msk.f32.mxu0 %vm6291_vm0, %v6292_v6 }
0x2c4b   :  { %6170 = vmatprep.subr.bf16.mxu0 %v6290_v3 }
0x2c4e   :  { %6172 = vmatpush3.bf16.msra.mxu0 %v6363_v8 }
0x2c4f   :  { %6173 = vmatprep.subr.bf16.mxu0 %v6290_v3 }
0x2d1c   :  { %v4045_v36 = vpop.f32.mrb[50].mxu0 }
0x2d1d   :  { %v4046_v37 = vadd.f32 %v6883_v1, %v4045_v36  ;;  %v5620_v38 = vpop.f32.mrb[51].mxu0 }
0x2d1f   :  { %v4049_v39 = vmul.f32 %v4046_v37, %v3899_v28  ;;  %v4351_v43 = vmul.f32 2.0, %v4046_v37 }
0x2d21   :  { %v4050_v40 = vadd.f32 %v4049_v39, %v7011_v18  ;;  %v4352_v49 = vadd.f32 %v4351_v43, %v3895_v29 }
0x2d23   :  { %5630 = vmatmul.mubr.msk.f32.vlgmr.msra.gmra.mrb[52].mxu1 %vm55_vm1, %v4050_v40 }
0x2d24   :  { %6157 = vmatpush3.bf16.msra.mxu1 %v6375_v11  ;;  %5648 = vmatprep.mubr.msk.f32.mxu1 %vm6291_vm0, %v6292_v6 }
0x2d25   :  { %6158 = vmatprep.subr.bf16.mxu1 %v6290_v3 }
0x2d28   :  { %6160 = vmatpush3.bf16.msra.mxu1 %v6392_v14 }
0x2d29   :  { %6161 = vmatprep.subr.bf16.mxu1 %v6290_v3 }
0x2d2c   :  { %6163 = vmatpush3.bf16.msra.mxu1 %v6402_v17 }
0x2d2d   :  { %6164 = vmatprep.subr.bf16.mxu1 %v6290_v3 }
0x2d30   :  { %6166 = vmatpush3.bf16.msra.mxu1 %v6411_v20 }
0x2df6   :  { %v4120_v4 = vpop.f32.mrb[52].mxu1 }
0x2df7   :  { %v4121_v8 = vadd.f32 %v6869_v58, %v4120_v4  ;;  %v5631_v41 = vpop.f32.mrb[53].mxu1 }
0x2df9   :  { %6245 = vtanh.f32 %v4121_v8 }
0x2e03   :  { %v6246_v42 = vpop.eup %6245 }
0x2e04   :  { %5649 = vmatmul.mubr.msk.f32.vlgmr.msra.gmra.mrb[54].mxu1 %vm134_vm2, %v6246_v42 }
0x2ed7   :  { %v4194_v44 = vpop.f32.mrb[54].mxu1 }
0x2ed8   :  { %v4195_v46 = vadd.f32 %v6883_v1, %v4194_v44  ;;  %v5650_v47 = vpop.f32.mrb[55].mxu1 }
0x2eda   :  { %v4199_v50 = vmul.f32 %v4198_v45, %v4195_v46  ;;  %v4353_v51 = vmul.f32 2.0, %v4195_v46 }
0x2edc   :  { %v4200_v52 = vadd.f32 %v4199_v50, %v7011_v18  ;;  %v4354_v53 = vadd.f32 %v4353_v51, %v4352_v49 }
0x2ede   :  { %5660 = vmatmul.mubr.msk.f32.vlgmr.msra.gmra.mrb[52].mxu0 %vm55_vm1, %v4200_v52 }
0x2edf   :  { %6175 = vmatpush3.bf16.msra.mxu0 %v6375_v11  ;;  %5678 = vmatprep.mubr.msk.f32.mxu0 %vm6291_vm0, %v6292_v6 }
0x2ee0   :  { %6176 = vmatprep.subr.bf16.mxu0 %v6290_v3 }
0x2ee3   :  { %6178 = vmatpush3.bf16.msra.mxu0 %v6392_v14 }
0x2ee4   :  { %6179 = vmatprep.subr.bf16.mxu0 %v6290_v3 }
0x2ee7   :  { %6181 = vmatpush3.bf16.msra.mxu0 %v6402_v17 }
0x2ee8   :  { %6182 = vmatprep.subr.bf16.mxu0 %v6290_v3 }
0x2eeb   :  { %6184 = vmatpush3.bf16.msra.mxu0 %v6411_v20 }
0x2fb1   :  { %v4270_v54 = vpop.f32.mrb[52].mxu0 }
0x2fb2   :  { %v4271_v55 = vadd.f32 %v6869_v58, %v4270_v54  ;;  %v5661_v21 = vpop.f32.mrb[53].mxu0 }
0x2fb4   :  { %6247 = vtanh.f32 %v4271_v55 }
0x2fbe   :  { %v6248_v11 = vpop.eup %6247 }
0x2fbf   :  { %5679 = vmatmul.mubr.msk.f32.vlgmr.msra.gmra.mrb[54].mxu0 %vm134_vm2, %v6248_v11 }
0x3092   :  { %v4344_v6 = vpop.f32.mrb[54].mxu0 }
0x3093   :  { %v4345_v14 = vadd.f32 %v6883_v1, %v4344_v6  ;;  %v5680_v56 = vpop.f32.mrb[55].mxu0 }
0x3095   :  { %v4355_v26 = vadd.f32 %v4354_v53, %v4345_v14 }
0x3097   :  { %v4357_v17 = vmul.f32 %v4356_v57, %v4355_v26 }
0x3099   :  { %v4358_v3 = vadd.f32 %v4357_v17, %v7011_v18 }
0x309b   :  { %4360 = vrot.lane.b32.xlu1 %v4358_v3, %s6295_s26 }
0x310d   :  { %v4361_v20 = vpop.permute.xlu1 %4360 }
0x310e   :  { %4363 = vst.msk [vmem:[#allocation4 + $0x8] sm:$0xff] %vm1905_vm5, %v4361_v20 }
0x310f   :  { %6274 = shalt.err (!%p6271_p9)
}
0x3110   :  { %s6275_s12 = scalar_lea.hbm %s7113_s6, 256 }
0x3111   :  { %p6276_p10 = scmp.ne.s32.totalorder %s7113_s6, %s6275_s12  ;;  %p6279_p11 = scmp.lt.u32.totalorder %s6275_s12, %s7113_s6 }
0x3113   :  { %p6281_p12 = pnand %p6279_p11, %p6276_p10 }
0x3115   :  { %6284 = shalt.err (!%p6281_p12)
}
0x3116   :  { %4373 = dma.vmem_to_hbm [thread:$0]  %s4371_s10, 256, %s7113_s6, [#allocation5]  }
0x3117   :  { %6287 = dma.done.wait [#allocation5], 256  }
0x3118   :  { %6288 = vsyncadd [#allocation5], 4294967040 }
0x3119   :  { %4377 = vsyncpa [#allocation5], 1 }

</bundles_post_ra>
